<compile_context>
chip_gen: v5e
topology: v5e:2x2
jax: 0.10.0
libtpu: 0.0.40
codegen_flags: <defaults>
</compile_context>

<pallas_src>
import functools

import jax
import jax.numpy as jnp
from jax.experimental import pallas as pl
from jax.experimental.pallas import tpu as pltpu

# ----------------------------- hyperparameters ------------------------------
INPUT_VARS    = 3            # features of x (lstm1 input size)
EX_VARS       = 4            # exogenous vars (x2 width), x2[:,1] drives the gather
BACKCAST_LEN  = 8
FORECAST_LEN  = 4
R_UNITS       = 32           # LSTM hidden units
FC_UNITS      = 32
NUM_FC_LAYERS = 2            # -> fc_layers = [Linear(3R+ex, fc), Linear(fc, out)]
BATCH_SIZE    = 4            # self.bs (module hyperparameter)
KERNEL_BATCH  = 8            # padded batch inside the kernel (full sublane tile)
MAX_X3_LEN    = 8            # also used as x3 sequence length T2
T1            = BACKCAST_LEN # x sequence length
T2            = MAX_X3_LEN
OUT_DIM       = BACKCAST_LEN + FORECAST_LEN
SAMPLES       = 3            # < BATCH_SIZE to exercise the padding path


# ------------------------------ fused Pallas kernel -------------------------
def block_kernel(xc_ref, x3_ref, x2_ref,
                 wih1_ref, whh1_ref, b1_ref,          # stacked bidirectional lstm1
                 wm_ref, bm_ref,                      # fused map_h / map_c
                 wih2_ref, whh2_ref, b2_ref,          # lstm2
                 w0_ref, b0_ref, w1_ref, b1fc_ref,    # FC stack
                 out_ref,
                 xin1_scr, xin2_scr,                  # VMEM scratch for batched proj
                 *, batch, max_x3_len):
    """Fused Block forward.

    xc_ref : (T1*B, 2*F1) time-major flattened, features = [x[t] | x[T1-1-t]]
    x3_ref : (T2*B, F2)   time-major flattened
    Stacked lstm1 gate layout along the 8R axis (R-wide blocks):
        [i_f, i_b, f_f, f_b, g_f, g_b, o_f, o_b]
    i/f/o gate pre-activations arrive pre-scaled by 0.5 (folded into the
    weights), so sigmoid(x) == 0.5 * tanh(gates) + 0.5 -> one tanh per step.
    State layout: hcat = [h_fwd | h_bwd], ccat = [c_fwd | c_bwd]  (B, 2R).
    """
    B = batch
    R = whh2_ref.shape[0]
    T1_ = xc_ref.shape[0] // B
    T2_ = x3_ref.shape[0] // B
    f32 = jnp.float32

    # Recurrent weights loaded once (re-used by every unrolled step).
    whh1 = whh1_ref[...]                                   # (2R, 8R)
    whh2 = whh2_ref[...]                                   # (R,  4R)

    # ------- batched input projections: ONE matmul per LSTM, bias folded in --
    xin1_scr[...] = (jnp.dot(xc_ref[...], wih1_ref[...],
                             preferred_element_type=f32) + b1_ref[...])   # (T1*B, 8R)
    xin2_scr[...] = (jnp.dot(x3_ref[...], wih2_ref[...],
                             preferred_element_type=f32) + b2_ref[...])   # (T2*B, 4R)

    # ---------------- LSTM1: fwd + bwd fused into one 8R-wide recurrence -----
    hcat = jnp.zeros((B, 2 * R), f32)       # [h_fwd | h_bwd]
    ccat = jnp.zeros((B, 2 * R), f32)       # [c_fwd | c_bwd]
    h_bwd_at_last_t = None

    for t in range(T1_):                    # static unroll (T1 = 8)
        gates = (xin1_scr[pl.ds(t * B, B), :]
                 + jnp.dot(hcat, whh1, preferred_element_type=f32))       # (B, 8R)
        tg = jnp.tanh(gates)                # single full-width EUP pass
        sg = 0.5 * tg + 0.5                 # sigmoid lanes (VPU fixup)
        i = sg[:, 0 * R:2 * R]              # [i_f | i_b]
        f = sg[:, 2 * R:4 * R]              # [f_f | f_b]
        g = tg[:, 4 * R:6 * R]              # [g_f | g_b]  (unscaled -> true tanh)
        o = sg[:, 6 * R:8 * R]              # [o_f | o_b]
        ccat = f * ccat + i * g
        hcat = o * jnp.tanh(ccat)
        if t == 0:
            # backward direction's output at original time T1-1 is its 1st step
            h_bwd_at_last_t = hcat[:, R:2 * R]

    # lstm1_out[:, -1, :] = [h_fwd(T1-1) | h_bwd(at original t = T1-1)]
    lstm1_last = jnp.concatenate([hcat[:, 0:R], h_bwd_at_last_t], axis=1)  # (B, 2R)

    # ---------------- map_h / map_c fused (block-diagonal) -------------------
    hc = jnp.concatenate([hcat, ccat], axis=1)                             # (B, 4R)
    hc0 = jnp.tanh(jnp.dot(hc, wm_ref[...], preferred_element_type=f32)
                   + bm_ref[...])                                          # (B, 2R)
    h = hc0[:, 0:R]                                                        # h2_0
    c = hc0[:, R:2 * R]                                                    # c2_0

    # ---------------- LSTM2 with per-sample output gather --------------------
    x2 = x2_ref[...]
    # sequence_lengths = long(x2[:,1] * max_x3_len), clamped into [0, T2-1]
    seq_len = jnp.clip((x2[:, 1:2] * max_x3_len).astype(jnp.int32), 0, T2_ - 1)

    sel = jnp.zeros((B, R), f32)
    for t in range(T2_):                    # static unroll (T2 = 8)
        gates = (xin2_scr[pl.ds(t * B, B), :]
                 + jnp.dot(h, whh2, preferred_element_type=f32))           # (B, 4R)
        tg = jnp.tanh(gates)
        sg = 0.5 * tg + 0.5
        c = sg[:, R:2 * R] * c + sg[:, 0:R] * tg[:, 2 * R:3 * R]
        h = sg[:, 3 * R:4 * R] * jnp.tanh(c)
        sel = jnp.where(seq_len == t, h, sel)

    # ---------------- FC stack: Linear + ReLU, Linear (dropout = identity) ---
    feat = jnp.concatenate([lstm1_last, sel, x2], axis=1)                  # (B, 3R+ex)
    hid = jnp.maximum(
        jnp.dot(feat, w0_ref[...], preferred_element_type=f32) + b0_ref[...], 0.0)
    out_ref[...] = (jnp.dot(hid, w1_ref[...], preferred_element_type=f32)
                    + b1fc_ref[...])


# ------------------------- one-time parameter preparation --------------------
def _scale_ifo(w):
    """Scale i/f/o gate columns (PyTorch [i,f,g,o] layout along 4R) by 0.5."""
    R = R_UNITS
    scale = jnp.concatenate([jnp.full((2 * R,), 0.5, jnp.float32),
                             jnp.ones((R,), jnp.float32),
                             jnp.full((R,), 0.5, jnp.float32)], axis=0)
    return (w * scale).astype(jnp.float32)


def _bidir_stack(wf, wb):
    """(D,4R),(D,4R) -> (2D,8R) block-structured, gate blocks interleaved
    [i_f, i_b, f_f, f_b, g_f, g_b, o_f, o_b]."""
    R = R_UNITS
    D = wf.shape[0]
    z = jnp.zeros((D, R), jnp.float32)
    cols = []
    for k in range(4):
        cols.append(jnp.concatenate([wf[:, k * R:(k + 1) * R], z], axis=0))
        cols.append(jnp.concatenate([z, wb[:, k * R:(k + 1) * R]], axis=0))
    return jnp.concatenate(cols, axis=1)


def _bidir_bias(bf, bb):
    """(1,4R),(1,4R) -> (1,8R) with the same interleaved gate-block layout."""
    R = R_UNITS
    cols = []
    for k in range(4):
        cols.append(bf[:, k * R:(k + 1) * R])
        cols.append(bb[:, k * R:(k + 1) * R])
    return jnp.concatenate(cols, axis=1)


def _map_stack(wmh, wmc):
    """(2R,R),(2R,R) -> (4R,2R) block-diagonal so map_h/map_c fuse into one matmul."""
    R = R_UNITS
    z = jnp.zeros((2 * R, R), jnp.float32)
    top = jnp.concatenate([wmh, z], axis=1)
    bot = jnp.concatenate([z, wmc], axis=1)
    return jnp.concatenate([top, bot], axis=0)


def prepare_params(params):
    """Precompute the stacked/scaled kernel-side weights ONCE (outside jit)."""
    prep = {
        "wih1": _bidir_stack(_scale_ifo(params["wih_f"]), _scale_ifo(params["wih_b"])),
        "whh1": _bidir_stack(_scale_ifo(params["whh_f"]), _scale_ifo(params["whh_b"])),
        "b1":   _bidir_bias(_scale_ifo(params["b_f"]), _scale_ifo(params["b_b"])),
        "wm":   _map_stack(params["wmh"], params["wmc"]),
        "bm":   jnp.concatenate([params["bmh"], params["bmc"]], axis=1),
        "wih2": _scale_ifo(params["wih2"]),
        "whh2": _scale_ifo(params["whh2"]),
        "b2":   _scale_ifo(params["b2"]),
        "w0": params["w0"], "b0": params["b0"],
        "w1": params["w1"], "b1fc": params["b1"],
    }
    return jax.tree_util.tree_map(jax.block_until_ready, prep)


# ------------------------------- call wrapper --------------------------------
_VMEM_SPEC = pl.BlockSpec(memory_space=pltpu.MemorySpace.VMEM)


def _block_forward_impl(x, x2, x3, prep):
    """x: (S, T1, INPUT_VARS), x2: (S, EX_VARS), x3: (S, T2, INPUT_VARS-1)."""
    samples = x.shape[0]
    B = KERNEL_BATCH
    assert samples <= B, "kernel batch must cover all samples"
    pad = B - samples
    x = jnp.pad(x, ((0, pad), (0, 0), (0, 0)))
    x2 = jnp.pad(x2, ((0, pad), (0, 0)))
    x3 = jnp.pad(x3, ((0, pad), (0, 0), (0, 0)))

    # Time-major layout + reversed copy packed along features so the backward
    # direction's input projection comes from the same stacked matmul; then
    # flattened to (T*B, F) so the kernel does ONE batched projection per LSTM.
    x_tm = jnp.transpose(x, (1, 0, 2))                               # (T1, B, F1)
    xc = jnp.concatenate([x_tm, x_tm[::-1]], axis=-1)                # (T1, B, 2*F1)
    xc = xc.reshape(T1 * B, 2 * INPUT_VARS)
    x3_flat = jnp.transpose(x3, (1, 0, 2)).reshape(T2 * B, INPUT_VARS - 1)

    n_in = 15
    y = pl.pallas_call(
        functools.partial(block_kernel, batch=B, max_x3_len=MAX_X3_LEN),
        out_shape=jax.ShapeDtypeStruct((B, OUT_DIM), jnp.float32),
        in_specs=[_VMEM_SPEC] * n_in,
        out_specs=_VMEM_SPEC,
        scratch_shapes=[pltpu.VMEM((T1 * B, 8 * R_UNITS), jnp.float32),
                        pltpu.VMEM((T2 * B, 4 * R_UNITS), jnp.float32)],
    )(xc, x3_flat, x2,
      prep["wih1"], prep["whh1"], prep["b1"],
      prep["wm"], prep["bm"],
      prep["wih2"], prep["whh2"], prep["b2"],
      prep["w0"], prep["b0"], prep["w1"], prep["b1fc"])

    return y[:samples, :BACKCAST_LEN], y[:samples, BACKCAST_LEN:]


block_forward = jax.jit(_block_forward_impl)


# --------------------------- pure-JAX reference ------------------------------
def _cell_ref(x_t, h, c, wih, whh, b):
    R = h.shape[1]
    g = x_t @ wih + h @ whh + b
    i = jax.nn.sigmoid(g[:, :R]); f = jax.nn.sigmoid(g[:, R:2 * R])
    gg = jnp.tanh(g[:, 2 * R:3 * R]); o = jax.nn.sigmoid(g[:, 3 * R:])
    c = f * c + i * gg
    return o * jnp.tanh(c), c


def block_forward_ref(x, x2, x3, p):
    samples = x.shape[0]
    bs = BATCH_SIZE
    if samples < bs:
        pad = bs - samples
        x = jnp.pad(x, ((0, pad), (0, 0), (0, 0)))
        x2 = jnp.pad(x2, ((0, pad), (0, 0)))
        x3 = jnp.pad(x3, ((0, pad), (0, 0), (0, 0)))
    B, T, _ = x.shape
    R = R_UNITS

    h = c = jnp.zeros((B, R), jnp.float32)
    outs_f = []
    for t in range(T):
        h, c = _cell_ref(x[:, t], h, c, p["wih_f"], p["whh_f"], p["b_f"])
        outs_f.append(h)
    h_f, c_f = h, c

    h = c = jnp.zeros((B, R), jnp.float32)
    outs_b = [None] * T
    for t in range(T - 1, -1, -1):
        h, c = _cell_ref(x[:, t], h, c, p["wih_b"], p["whh_b"], p["b_b"])
        outs_b[t] = h
    h_b, c_b = h, c

    lstm1_last = jnp.concatenate([outs_f[-1], outs_b[-1]], axis=1)
    h_cat = jnp.concatenate([h_f, h_b], axis=1)
    c_cat = jnp.concatenate([c_f, c_b], axis=1)

    h0 = jnp.tanh(h_cat @ p["wmh"] + p["bmh"])
    c0 = jnp.tanh(c_cat @ p["wmc"] + p["bmc"])
    seq = jnp.clip((x2[:, 1] * MAX_X3_LEN).astype(jnp.int32), 0, x3.shape[1] - 1)

    h, c = h0, c0
    outs2 = []
    for t in range(x3.shape[1]):
        h, c = _cell_ref(x3[:, t], h, c, p["wih2"], p["whh2"], p["b2"])
        outs2.append(h)
    outs2 = jnp.stack(outs2, axis=1)
    lstm2_sel = outs2[jnp.arange(B), seq, :]

    feat = jnp.concatenate([lstm1_last, lstm2_sel, x2], axis=1)
    hmid = jax.nn.relu(feat @ p["w0"] + p["b0"])
    y = hmid @ p["w1"] + p["b1"]
    return y[:samples, :BACKCAST_LEN], y[:samples, BACKCAST_LEN:]


# ----------------------------------- main ------------------------------------
if __name__ == "__main__":
    key = jax.random.PRNGKey(0)
    ks = jax.random.split(key, 24)

    def init(k, shape, scale=0.1):
        return (scale * jax.random.normal(k, shape)).astype(jnp.float32)

    R = R_UNITS
    params = {
        # lstm1 forward / backward (PyTorch gate order i,f,g,o along the 4R axis)
        "wih_f": init(ks[0], (INPUT_VARS, 4 * R)),
        "whh_f": init(ks[1], (R, 4 * R)),
        "b_f":   init(ks[2], (1, 4 * R)),          # b_ih + b_hh folded together
        "wih_b": init(ks[3], (INPUT_VARS, 4 * R)),
        "whh_b": init(ks[4], (R, 4 * R)),
        "b_b":   init(ks[5], (1, 4 * R)),
        # map_h / map_c
        "wmh": init(ks[6], (2 * R, R)), "bmh": init(ks[7], (1, R)),
        "wmc": init(ks[8], (2 * R, R)), "bmc": init(ks[9], (1, R)),
        # lstm2 (input size = input_vars - 1)
        "wih2": init(ks[10], (INPUT_VARS - 1, 4 * R)),
        "whh2": init(ks[11], (R, 4 * R)),
        "b2":   init(ks[12], (1, 4 * R)),
        # fc stack (unrestricted=True: 3R + ex_vars -> fc_units -> out)
        "w0": init(ks[13], (3 * R + EX_VARS, FC_UNITS)), "b0": init(ks[14], (1, FC_UNITS)),
        "w1": init(ks[15], (FC_UNITS, OUT_DIM)),         "b1": init(ks[16], (1, OUT_DIM)),
    }

    # One-time kernel-side weight layout prep (cached; NOT rebuilt per call).
    prep = prepare_params(params)

    x  = jax.random.normal(ks[17], (SAMPLES, T1, INPUT_VARS), jnp.float32)
    x2 = jax.random.uniform(ks[18], (SAMPLES, EX_VARS), jnp.float32)   # x2[:,1] in [0,1)
    x3 = jax.random.normal(ks[19], (SAMPLES, T2, INPUT_VARS - 1), jnp.float32)

    back, fore = block_forward(x, x2, x3, prep)
    jax.block_until_ready(back)
    jax.block_until_ready(fore)

    back_ref, fore_ref = block_forward_ref(x, x2, x3, params)
    assert back.shape == (SAMPLES, BACKCAST_LEN) and fore.shape == (SAMPLES, FORECAST_LEN)
    assert jnp.allclose(back, back_ref, atol=1e-2, rtol=1e-2)
    assert jnp.allclose(fore, fore_ref, atol=1e-2, rtol=1e-2)

    print("KERNEL_OK")
</pallas_src>

<mosaic_0001>
module attributes {stable_mosaic.version = 11 : i64} {
  func.func @block_kernel(%arg0: memref<64x6xf32, #tpu.memory_space<vmem>>, %arg1: memref<64x2xf32, #tpu.memory_space<vmem>>, %arg2: memref<8x4xf32, #tpu.memory_space<vmem>>, %arg3: memref<6x256xf32, #tpu.memory_space<vmem>>, %arg4: memref<64x256xf32, #tpu.memory_space<vmem>>, %arg5: memref<1x256xf32, #tpu.memory_space<vmem>>, %arg6: memref<128x64xf32, #tpu.memory_space<vmem>>, %arg7: memref<1x64xf32, #tpu.memory_space<vmem>>, %arg8: memref<2x128xf32, #tpu.memory_space<vmem>>, %arg9: memref<32x128xf32, #tpu.memory_space<vmem>>, %arg10: memref<1x128xf32, #tpu.memory_space<vmem>>, %arg11: memref<100x32xf32, #tpu.memory_space<vmem>>, %arg12: memref<1x32xf32, #tpu.memory_space<vmem>>, %arg13: memref<32x12xf32, #tpu.memory_space<vmem>>, %arg14: memref<1x12xf32, #tpu.memory_space<vmem>>, %arg15: memref<8x12xf32, #tpu.memory_space<vmem>>, %arg16: memref<64x256xf32, #tpu.memory_space<vmem>>, %arg17: memref<64x128xf32, #tpu.memory_space<vmem>>) attributes {dimension_semantics = [], scalar_prefetch = 0 : i64, scratch_operands = 2 : i64, tpu.core_type = #tpu.core_type<tc>} {
    %c0 = arith.constant 0 : index
    %c0_0 = arith.constant 0 : index
    %0 = vector.load %arg4[%c0, %c0_0] : memref<64x256xf32, #tpu.memory_space<vmem>>, vector<64x256xf32>
    %c0_1 = arith.constant 0 : index
    %c0_2 = arith.constant 0 : index
    %1 = vector.load %arg9[%c0_1, %c0_2] : memref<32x128xf32, #tpu.memory_space<vmem>>, vector<32x128xf32>
    %c0_3 = arith.constant 0 : index
    %c0_4 = arith.constant 0 : index
    %2 = vector.load %arg0[%c0_3, %c0_4] : memref<64x6xf32, #tpu.memory_space<vmem>>, vector<64x6xf32>
    %c0_5 = arith.constant 0 : index
    %c0_6 = arith.constant 0 : index
    %3 = vector.load %arg3[%c0_5, %c0_6] : memref<6x256xf32, #tpu.memory_space<vmem>>, vector<6x256xf32>
    %cst = arith.constant dense<0.000000e+00> : vector<64x256xf32>
    %4 = tpu.matmul %2, %3, %cst {dimension_numbers = #tpu.dot_dimension_numbers<[1], [0], [0], [1], [0, 0, 1, 1], [], []>} : vector<64x6xf32>, vector<6x256xf32>, vector<64x256xf32> -> vector<64x256xf32>
    %c0_7 = arith.constant 0 : index
    %c0_8 = arith.constant 0 : index
    %5 = vector.load %arg5[%c0_7, %c0_8] : memref<1x256xf32, #tpu.memory_space<vmem>>, vector<1x256xf32>
    %6 = vector.broadcast %5 : vector<1x256xf32> to vector<64x256xf32>
    %7 = arith.addf %4, %6 : vector<64x256xf32>
    %c0_9 = arith.constant 0 : index
    %c0_10 = arith.constant 0 : index
    %8 = vector.load %arg16[%c0_9, %c0_10] : memref<64x256xf32, #tpu.memory_space<vmem>>, vector<64x256xf32>
    tpu.vector_store %arg16[%c0_9, %c0_10], %7 {strides = array<i32>} : memref<64x256xf32, #tpu.memory_space<vmem>>, vector<64x256xf32>,
    %c0_11 = arith.constant 0 : index
    %c0_12 = arith.constant 0 : index
    %9 = vector.load %arg1[%c0_11, %c0_12] : memref<64x2xf32, #tpu.memory_space<vmem>>, vector<64x2xf32>
    %c0_13 = arith.constant 0 : index
    %c0_14 = arith.constant 0 : index
    %10 = vector.load %arg8[%c0_13, %c0_14] : memref<2x128xf32, #tpu.memory_space<vmem>>, vector<2x128xf32>
    %cst_15 = arith.constant dense<0.000000e+00> : vector<64x128xf32>
    %11 = tpu.matmul %9, %10, %cst_15 {dimension_numbers = #tpu.dot_dimension_numbers<[1], [0], [0], [1], [0, 0, 1, 1], [], []>} : vector<64x2xf32>, vector<2x128xf32>, vector<64x128xf32> -> vector<64x128xf32>
    %c0_16 = arith.constant 0 : index
    %c0_17 = arith.constant 0 : index
    %12 = vector.load %arg10[%c0_16, %c0_17] : memref<1x128xf32, #tpu.memory_space<vmem>>, vector<1x128xf32>
    %13 = vector.broadcast %12 : vector<1x128xf32> to vector<64x128xf32>
    %14 = arith.addf %11, %13 : vector<64x128xf32>
    %c0_18 = arith.constant 0 : index
    %c0_19 = arith.constant 0 : index
    %15 = vector.load %arg17[%c0_18, %c0_19] : memref<64x128xf32, #tpu.memory_space<vmem>>, vector<64x128xf32>
    tpu.vector_store %arg17[%c0_18, %c0_19], %14 {strides = array<i32>} : memref<64x128xf32, #tpu.memory_space<vmem>>, vector<64x128xf32>,
    %cst_20 = arith.constant 0.000000e+00 : f32
    %16 = vector.broadcast %cst_20 : f32 to vector<8x64xf32>
    %cst_21 = arith.constant 0.000000e+00 : f32
    %17 = vector.broadcast %cst_21 : f32 to vector<8x64xf32>
    %c0_22 = arith.constant 0 : index
    %c0_23 = arith.constant 0 : index
    %18 = vector.load %arg16[%c0_22, %c0_23] : memref<64x256xf32, #tpu.memory_space<vmem>>, vector<8x256xf32>
    %cst_24 = arith.constant dense<0.000000e+00> : vector<8x256xf32>
    %19 = tpu.matmul %16, %0, %cst_24 {dimension_numbers = #tpu.dot_dimension_numbers<[1], [0], [0], [1], [0, 0, 1, 1], [], []>} : vector<8x64xf32>, vector<64x256xf32>, vector<8x256xf32> -> vector<8x256xf32>
    %20 = arith.addf %18, %19 : vector<8x256xf32>
    %21 = math.tanh %20 : vector<8x256xf32>
    %cst_25 = arith.constant 5.000000e-01 : f32
    %22 = vector.broadcast %cst_25 : f32 to vector<8x256xf32>
    %23 = arith.mulf %22, %21 : vector<8x256xf32>
    %cst_26 = arith.constant 5.000000e-01 : f32
    %24 = vector.broadcast %cst_26 : f32 to vector<8x256xf32>
    %25 = arith.addf %23, %24 : vector<8x256xf32>
    %26 = vector.extract_strided_slice %25 {offsets = [0, 0], sizes = [8, 64], strides = [1, 1]} : vector<8x256xf32> to vector<8x64xf32>
    %27 = vector.extract_strided_slice %25 {offsets = [0, 64], sizes = [8, 64], strides = [1, 1]} : vector<8x256xf32> to vector<8x64xf32>
    %28 = vector.extract_strided_slice %21 {offsets = [0, 128], sizes = [8, 64], strides = [1, 1]} : vector<8x256xf32> to vector<8x64xf32>
    %29 = vector.extract_strided_slice %25 {offsets = [0, 192], sizes = [8, 64], strides = [1, 1]} : vector<8x256xf32> to vector<8x64xf32>
    %30 = arith.mulf %27, %17 : vector<8x64xf32>
    %31 = arith.mulf %26, %28 : vector<8x64xf32>
    %32 = arith.addf %30, %31 : vector<8x64xf32>
    %33 = math.tanh %32 : vector<8x64xf32>
    %34 = arith.mulf %29, %33 : vector<8x64xf32>
    %35 = vector.extract_strided_slice %34 {offsets = [0, 32], sizes = [8, 32], strides = [1, 1]} : vector<8x64xf32> to vector<8x32xf32>
    %c8 = arith.constant 8 : index
    %c0_27 = arith.constant 0 : index
    %36 = vector.load %arg16[%c8, %c0_27] : memref<64x256xf32, #tpu.memory_space<vmem>>, vector<8x256xf32>
    %cst_28 = arith.constant dense<0.000000e+00> : vector<8x256xf32>
    %37 = tpu.matmul %34, %0, %cst_28 {dimension_numbers = #tpu.dot_dimension_numbers<[1], [0], [0], [1], [0, 0, 1, 1], [], []>} : vector<8x64xf32>, vector<64x256xf32>, vector<8x256xf32> -> vector<8x256xf32>
    %38 = arith.addf %36, %37 : vector<8x256xf32>
    %39 = math.tanh %38 : vector<8x256xf32>
    %cst_29 = arith.constant 5.000000e-01 : f32
    %40 = vector.broadcast %cst_29 : f32 to vector<8x256xf32>
    %41 = arith.mulf %40, %39 : vector<8x256xf32>
    %cst_30 = arith.constant 5.000000e-01 : f32
    %42 = vector.broadcast %cst_30 : f32 to vector<8x256xf32>
    %43 = arith.addf %41, %42 : vector<8x256xf32>
    %44 = vector.extract_strided_slice %43 {offsets = [0, 0], sizes = [8, 64], strides = [1, 1]} : vector<8x256xf32> to vector<8x64xf32>
    %45 = vector.extract_strided_slice %43 {offsets = [0, 64], sizes = [8, 64], strides = [1, 1]} : vector<8x256xf32> to vector<8x64xf32>
    %46 = vector.extract_strided_slice %39 {offsets = [0, 128], sizes = [8, 64], strides = [1, 1]} : vector<8x256xf32> to vector<8x64xf32>
    %47 = vector.extract_strided_slice %43 {offsets = [0, 192], sizes = [8, 64], strides = [1, 1]} : vector<8x256xf32> to vector<8x64xf32>
    %48 = arith.mulf %45, %32 : vector<8x64xf32>
    %49 = arith.mulf %44, %46 : vector<8x64xf32>
    %50 = arith.addf %48, %49 : vector<8x64xf32>
    %51 = math.tanh %50 : vector<8x64xf32>
    %52 = arith.mulf %47, %51 : vector<8x64xf32>
    %c16 = arith.constant 16 : index
    %c0_31 = arith.constant 0 : index
    %53 = vector.load %arg16[%c16, %c0_31] : memref<64x256xf32, #tpu.memory_space<vmem>>, vector<8x256xf32>
    %cst_32 = arith.constant dense<0.000000e+00> : vector<8x256xf32>
    %54 = tpu.matmul %52, %0, %cst_32 {dimension_numbers = #tpu.dot_dimension_numbers<[1], [0], [0], [1], [0, 0, 1, 1], [], []>} : vector<8x64xf32>, vector<64x256xf32>, vector<8x256xf32> -> vector<8x256xf32>
    %55 = arith.addf %53, %54 : vector<8x256xf32>
    %56 = math.tanh %55 : vector<8x256xf32>
    %cst_33 = arith.constant 5.000000e-01 : f32
    %57 = vector.broadcast %cst_33 : f32 to vector<8x256xf32>
    %58 = arith.mulf %57, %56 : vector<8x256xf32>
    %cst_34 = arith.constant 5.000000e-01 : f32
    %59 = vector.broadcast %cst_34 : f32 to vector<8x256xf32>
    %60 = arith.addf %58, %59 : vector<8x256xf32>
    %61 = vector.extract_strided_slice %60 {offsets = [0, 0], sizes = [8, 64], strides = [1, 1]} : vector<8x256xf32> to vector<8x64xf32>
    %62 = vector.extract_strided_slice %60 {offsets = [0, 64], sizes = [8, 64], strides = [1, 1]} : vector<8x256xf32> to vector<8x64xf32>
    %63 = vector.extract_strided_slice %56 {offsets = [0, 128], sizes = [8, 64], strides = [1, 1]} : vector<8x256xf32> to vector<8x64xf32>
    %64 = vector.extract_strided_slice %60 {offsets = [0, 192], sizes = [8, 64], strides = [1, 1]} : vector<8x256xf32> to vector<8x64xf32>
    %65 = arith.mulf %62, %50 : vector<8x64xf32>
    %66 = arith.mulf %61, %63 : vector<8x64xf32>
    %67 = arith.addf %65, %66 : vector<8x64xf32>
    %68 = math.tanh %67 : vector<8x64xf32>
    %69 = arith.mulf %64, %68 : vector<8x64xf32>
    %c24 = arith.constant 24 : index
    %c0_35 = arith.constant 0 : index
    %70 = vector.load %arg16[%c24, %c0_35] : memref<64x256xf32, #tpu.memory_space<vmem>>, vector<8x256xf32>
    %cst_36 = arith.constant dense<0.000000e+00> : vector<8x256xf32>
    %71 = tpu.matmul %69, %0, %cst_36 {dimension_numbers = #tpu.dot_dimension_numbers<[1], [0], [0], [1], [0, 0, 1, 1], [], []>} : vector<8x64xf32>, vector<64x256xf32>, vector<8x256xf32> -> vector<8x256xf32>
    %72 = arith.addf %70, %71 : vector<8x256xf32>
    %73 = math.tanh %72 : vector<8x256xf32>
    %cst_37 = arith.constant 5.000000e-01 : f32
    %74 = vector.broadcast %cst_37 : f32 to vector<8x256xf32>
    %75 = arith.mulf %74, %73 : vector<8x256xf32>
    %cst_38 = arith.constant 5.000000e-01 : f32
    %76 = vector.broadcast %cst_38 : f32 to vector<8x256xf32>
    %77 = arith.addf %75, %76 : vector<8x256xf32>
    %78 = vector.extract_strided_slice %77 {offsets = [0, 0], sizes = [8, 64], strides = [1, 1]} : vector<8x256xf32> to vector<8x64xf32>
    %79 = vector.extract_strided_slice %77 {offsets = [0, 64], sizes = [8, 64], strides = [1, 1]} : vector<8x256xf32> to vector<8x64xf32>
    %80 = vector.extract_strided_slice %73 {offsets = [0, 128], sizes = [8, 64], strides = [1, 1]} : vector<8x256xf32> to vector<8x64xf32>
    %81 = vector.extract_strided_slice %77 {offsets = [0, 192], sizes = [8, 64], strides = [1, 1]} : vector<8x256xf32> to vector<8x64xf32>
    %82 = arith.mulf %79, %67 : vector<8x64xf32>
    %83 = arith.mulf %78, %80 : vector<8x64xf32>
    %84 = arith.addf %82, %83 : vector<8x64xf32>
    %85 = math.tanh %84 : vector<8x64xf32>
    %86 = arith.mulf %81, %85 : vector<8x64xf32>
    %c32 = arith.constant 32 : index
    %c0_39 = arith.constant 0 : index
    %87 = vector.load %arg16[%c32, %c0_39] : memref<64x256xf32, #tpu.memory_space<vmem>>, vector<8x256xf32>
    %cst_40 = arith.constant dense<0.000000e+00> : vector<8x256xf32>
    %88 = tpu.matmul %86, %0, %cst_40 {dimension_numbers = #tpu.dot_dimension_numbers<[1], [0], [0], [1], [0, 0, 1, 1], [], []>} : vector<8x64xf32>, vector<64x256xf32>, vector<8x256xf32> -> vector<8x256xf32>
    %89 = arith.addf %87, %88 : vector<8x256xf32>
    %90 = math.tanh %89 : vector<8x256xf32>
    %cst_41 = arith.constant 5.000000e-01 : f32
    %91 = vector.broadcast %cst_41 : f32 to vector<8x256xf32>
    %92 = arith.mulf %91, %90 : vector<8x256xf32>
    %cst_42 = arith.constant 5.000000e-01 : f32
    %93 = vector.broadcast %cst_42 : f32 to vector<8x256xf32>
    %94 = arith.addf %92, %93 : vector<8x256xf32>
    %95 = vector.extract_strided_slice %94 {offsets = [0, 0], sizes = [8, 64], strides = [1, 1]} : vector<8x256xf32> to vector<8x64xf32>
    %96 = vector.extract_strided_slice %94 {offsets = [0, 64], sizes = [8, 64], strides = [1, 1]} : vector<8x256xf32> to vector<8x64xf32>
    %97 = vector.extract_strided_slice %90 {offsets = [0, 128], sizes = [8, 64], strides = [1, 1]} : vector<8x256xf32> to vector<8x64xf32>
    %98 = vector.extract_strided_slice %94 {offsets = [0, 192], sizes = [8, 64], strides = [1, 1]} : vector<8x256xf32> to vector<8x64xf32>
    %99 = arith.mulf %96, %84 : vector<8x64xf32>
    %100 = arith.mulf %95, %97 : vector<8x64xf32>
    %101 = arith.addf %99, %100 : vector<8x64xf32>
    %102 = math.tanh %101 : vector<8x64xf32>
    %103 = arith.mulf %98, %102 : vector<8x64xf32>
    %c40 = arith.constant 40 : index
    %c0_43 = arith.constant 0 : index
    %104 = vector.load %arg16[%c40, %c0_43] : memref<64x256xf32, #tpu.memory_space<vmem>>, vector<8x256xf32>
    %cst_44 = arith.constant dense<0.000000e+00> : vector<8x256xf32>
    %105 = tpu.matmul %103, %0, %cst_44 {dimension_numbers = #tpu.dot_dimension_numbers<[1], [0], [0], [1], [0, 0, 1, 1], [], []>} : vector<8x64xf32>, vector<64x256xf32>, vector<8x256xf32> -> vector<8x256xf32>
    %106 = arith.addf %104, %105 : vector<8x256xf32>
    %107 = math.tanh %106 : vector<8x256xf32>
    %cst_45 = arith.constant 5.000000e-01 : f32
    %108 = vector.broadcast %cst_45 : f32 to vector<8x256xf32>
    %109 = arith.mulf %108, %107 : vector<8x256xf32>
    %cst_46 = arith.constant 5.000000e-01 : f32
    %110 = vector.broadcast %cst_46 : f32 to vector<8x256xf32>
    %111 = arith.addf %109, %110 : vector<8x256xf32>
    %112 = vector.extract_strided_slice %111 {offsets = [0, 0], sizes = [8, 64], strides = [1, 1]} : vector<8x256xf32> to vector<8x64xf32>
    %113 = vector.extract_strided_slice %111 {offsets = [0, 64], sizes = [8, 64], strides = [1, 1]} : vector<8x256xf32> to vector<8x64xf32>
    %114 = vector.extract_strided_slice %107 {offsets = [0, 128], sizes = [8, 64], strides = [1, 1]} : vector<8x256xf32> to vector<8x64xf32>
    %115 = vector.extract_strided_slice %111 {offsets = [0, 192], sizes = [8, 64], strides = [1, 1]} : vector<8x256xf32> to vector<8x64xf32>
    %116 = arith.mulf %113, %101 : vector<8x64xf32>
    %117 = arith.mulf %112, %114 : vector<8x64xf32>
    %118 = arith.addf %116, %117 : vector<8x64xf32>
    %119 = math.tanh %118 : vector<8x64xf32>
    %120 = arith.mulf %115, %119 : vector<8x64xf32>
    %c48 = arith.constant 48 : index
    %c0_47 = arith.constant 0 : index
    %121 = vector.load %arg16[%c48, %c0_47] : memref<64x256xf32, #tpu.memory_space<vmem>>, vector<8x256xf32>
    %cst_48 = arith.constant dense<0.000000e+00> : vector<8x256xf32>
    %122 = tpu.matmul %120, %0, %cst_48 {dimension_numbers = #tpu.dot_dimension_numbers<[1], [0], [0], [1], [0, 0, 1, 1], [], []>} : vector<8x64xf32>, vector<64x256xf32>, vector<8x256xf32> -> vector<8x256xf32>
    %123 = arith.addf %121, %122 : vector<8x256xf32>
    %124 = math.tanh %123 : vector<8x256xf32>
    %cst_49 = arith.constant 5.000000e-01 : f32
    %125 = vector.broadcast %cst_49 : f32 to vector<8x256xf32>
    %126 = arith.mulf %125, %124 : vector<8x256xf32>
    %cst_50 = arith.constant 5.000000e-01 : f32
    %127 = vector.broadcast %cst_50 : f32 to vector<8x256xf32>
    %128 = arith.addf %126, %127 : vector<8x256xf32>
    %129 = vector.extract_strided_slice %128 {offsets = [0, 0], sizes = [8, 64], strides = [1, 1]} : vector<8x256xf32> to vector<8x64xf32>
    %130 = vector.extract_strided_slice %128 {offsets = [0, 64], sizes = [8, 64], strides = [1, 1]} : vector<8x256xf32> to vector<8x64xf32>
    %131 = vector.extract_strided_slice %124 {offsets = [0, 128], sizes = [8, 64], strides = [1, 1]} : vector<8x256xf32> to vector<8x64xf32>
    %132 = vector.extract_strided_slice %128 {offsets = [0, 192], sizes = [8, 64], strides = [1, 1]} : vector<8x256xf32> to vector<8x64xf32>
    %133 = arith.mulf %130, %118 : vector<8x64xf32>
    %134 = arith.mulf %129, %131 : vector<8x64xf32>
    %135 = arith.addf %133, %134 : vector<8x64xf32>
    %136 = math.tanh %135 : vector<8x64xf32>
    %137 = arith.mulf %132, %136 : vector<8x64xf32>
    %c56 = arith.constant 56 : index
    %c0_51 = arith.constant 0 : index
    %138 = vector.load %arg16[%c56, %c0_51] : memref<64x256xf32, #tpu.memory_space<vmem>>, vector<8x256xf32>
    %cst_52 = arith.constant dense<0.000000e+00> : vector<8x256xf32>
    %139 = tpu.matmul %137, %0, %cst_52 {dimension_numbers = #tpu.dot_dimension_numbers<[1], [0], [0], [1], [0, 0, 1, 1], [], []>} : vector<8x64xf32>, vector<64x256xf32>, vector<8x256xf32> -> vector<8x256xf32>
    %140 = arith.addf %138, %139 : vector<8x256xf32>
    %141 = math.tanh %140 : vector<8x256xf32>
    %cst_53 = arith.constant 5.000000e-01 : f32
    %142 = vector.broadcast %cst_53 : f32 to vector<8x256xf32>
    %143 = arith.mulf %142, %141 : vector<8x256xf32>
    %cst_54 = arith.constant 5.000000e-01 : f32
    %144 = vector.broadcast %cst_54 : f32 to vector<8x256xf32>
    %145 = arith.addf %143, %144 : vector<8x256xf32>
    %146 = vector.extract_strided_slice %145 {offsets = [0, 0], sizes = [8, 64], strides = [1, 1]} : vector<8x256xf32> to vector<8x64xf32>
    %147 = vector.extract_strided_slice %145 {offsets = [0, 64], sizes = [8, 64], strides = [1, 1]} : vector<8x256xf32> to vector<8x64xf32>
    %148 = vector.extract_strided_slice %141 {offsets = [0, 128], sizes = [8, 64], strides = [1, 1]} : vector<8x256xf32> to vector<8x64xf32>
    %149 = vector.extract_strided_slice %145 {offsets = [0, 192], sizes = [8, 64], strides = [1, 1]} : vector<8x256xf32> to vector<8x64xf32>
    %150 = arith.mulf %147, %135 : vector<8x64xf32>
    %151 = arith.mulf %146, %148 : vector<8x64xf32>
    %152 = arith.addf %150, %151 : vector<8x64xf32>
    %153 = math.tanh %152 : vector<8x64xf32>
    %154 = arith.mulf %149, %153 : vector<8x64xf32>
    %155 = vector.extract_strided_slice %154 {offsets = [0, 0], sizes = [8, 32], strides = [1, 1]} : vector<8x64xf32> to vector<8x32xf32>
    %156 = tpu.concatenate %155, %35 in 1 : vector<8x32xf32>, vector<8x32xf32> -> vector<8x64xf32>
    %157 = tpu.concatenate %154, %152 in 1 : vector<8x64xf32>, vector<8x64xf32> -> vector<8x128xf32>
    %c0_55 = arith.constant 0 : index
    %c0_56 = arith.constant 0 : index
    %158 = vector.load %arg6[%c0_55, %c0_56] : memref<128x64xf32, #tpu.memory_space<vmem>>, vector<128x64xf32>
    %cst_57 = arith.constant dense<0.000000e+00> : vector<8x64xf32>
    %159 = tpu.matmul %157, %158, %cst_57 {dimension_numbers = #tpu.dot_dimension_numbers<[1], [0], [0], [1], [0, 0, 1, 1], [], []>} : vector<8x128xf32>, vector<128x64xf32>, vector<8x64xf32> -> vector<8x64xf32>
    %c0_58 = arith.constant 0 : index
    %c0_59 = arith.constant 0 : index
    %160 = vector.load %arg7[%c0_58, %c0_59] : memref<1x64xf32, #tpu.memory_space<vmem>>, vector<1x64xf32>
    %161 = vector.broadcast %160 : vector<1x64xf32> to vector<8x64xf32>
    %162 = arith.addf %159, %161 : vector<8x64xf32>
    %163 = math.tanh %162 : vector<8x64xf32>
    %164 = vector.extract_strided_slice %163 {offsets = [0, 0], sizes = [8, 32], strides = [1, 1]} : vector<8x64xf32> to vector<8x32xf32>
    %165 = vector.extract_strided_slice %163 {offsets = [0, 32], sizes = [8, 32], strides = [1, 1]} : vector<8x64xf32> to vector<8x32xf32>
    %c0_60 = arith.constant 0 : index
    %c0_61 = arith.constant 0 : index
    %166 = vector.load %arg2[%c0_60, %c0_61] : memref<8x4xf32, #tpu.memory_space<vmem>>, vector<8x4xf32>
    %167 = vector.extract_strided_slice %166 {offsets = [0, 1], sizes = [8, 1], strides = [1, 1]} : vector<8x4xf32> to vector<8x1xf32>
    %cst_62 = arith.constant 8.000000e+00 : f32
    %168 = vector.broadcast %cst_62 : f32 to vector<8x1xf32>
    %169 = arith.mulf %167, %168 : vector<8x1xf32>
    %170 = arith.fptosi %169 : vector<8x1xf32> to vector<8x1xi32>
    %c0_i32 = arith.constant 0 : i32
    %c7_i32 = arith.constant 7 : i32
    %171 = vector.broadcast %c0_i32 : i32 to vector<8x1xi32>
    %172 = arith.maxsi %171, %170 : vector<8x1xi32>
    %173 = vector.broadcast %c7_i32 : i32 to vector<8x1xi32>
    %174 = arith.minsi %173, %172 : vector<8x1xi32>
    %cst_63 = arith.constant 0.000000e+00 : f32
    %175 = vector.broadcast %cst_63 : f32 to vector<8x32xf32>
    %c0_64 = arith.constant 0 : index
    %c0_65 = arith.constant 0 : index
    %176 = vector.load %arg17[%c0_64, %c0_65] : memref<64x128xf32, #tpu.memory_space<vmem>>, vector<8x128xf32>
    %cst_66 = arith.constant dense<0.000000e+00> : vector<8x128xf32>
    %177 = tpu.matmul %164, %1, %cst_66 {dimension_numbers = #tpu.dot_dimension_numbers<[1], [0], [0], [1], [0, 0, 1, 1], [], []>} : vector<8x32xf32>, vector<32x128xf32>, vector<8x128xf32> -> vector<8x128xf32>
    %178 = arith.addf %176, %177 : vector<8x128xf32>
    %179 = math.tanh %178 : vector<8x128xf32>
    %cst_67 = arith.constant 5.000000e-01 : f32
    %180 = vector.broadcast %cst_67 : f32 to vector<8x128xf32>
    %181 = arith.mulf %180, %179 : vector<8x128xf32>
    %cst_68 = arith.constant 5.000000e-01 : f32
    %182 = vector.broadcast %cst_68 : f32 to vector<8x128xf32>
    %183 = arith.addf %181, %182 : vector<8x128xf32>
    %184 = vector.extract_strided_slice %183 {offsets = [0, 32], sizes = [8, 32], strides = [1, 1]} : vector<8x128xf32> to vector<8x32xf32>
    %185 = arith.mulf %184, %165 : vector<8x32xf32>
    %186 = vector.extract_strided_slice %183 {offsets = [0, 0], sizes = [8, 32], strides = [1, 1]} : vector<8x128xf32> to vector<8x32xf32>
    %187 = vector.extract_strided_slice %179 {offsets = [0, 64], sizes = [8, 32], strides = [1, 1]} : vector<8x128xf32> to vector<8x32xf32>
    %188 = arith.mulf %186, %187 : vector<8x32xf32>
    %189 = arith.addf %185, %188 : vector<8x32xf32>
    %190 = vector.extract_strided_slice %183 {offsets = [0, 96], sizes = [8, 32], strides = [1, 1]} : vector<8x128xf32> to vector<8x32xf32>
    %191 = math.tanh %189 : vector<8x32xf32>
    %192 = arith.mulf %190, %191 : vector<8x32xf32>
    %c0_i32_69 = arith.constant 0 : i32
    %193 = vector.broadcast %c0_i32_69 : i32 to vector<8x1xi32>
    %194 = arith.cmpi eq, %174, %193 : vector<8x1xi32>
    %195 = vector.shape_cast %194 : vector<8x1xi1> to vector<8x1xi1>
    %196 = vector.broadcast %195 : vector<8x1xi1> to vector<8x32xi1>
    %197 = arith.select %196, %192, %175 : vector<8x32xi1>, vector<8x32xf32>
    %c8_70 = arith.constant 8 : index
    %c0_71 = arith.constant 0 : index
    %198 = vector.load %arg17[%c8_70, %c0_71] : memref<64x128xf32, #tpu.memory_space<vmem>>, vector<8x128xf32>
    %cst_72 = arith.constant dense<0.000000e+00> : vector<8x128xf32>
    %199 = tpu.matmul %192, %1, %cst_72 {dimension_numbers = #tpu.dot_dimension_numbers<[1], [0], [0], [1], [0, 0, 1, 1], [], []>} : vector<8x32xf32>, vector<32x128xf32>, vector<8x128xf32> -> vector<8x128xf32>
    %200 = arith.addf %198, %199 : vector<8x128xf32>
    %201 = math.tanh %200 : vector<8x128xf32>
    %cst_73 = arith.constant 5.000000e-01 : f32
    %202 = vector.broadcast %cst_73 : f32 to vector<8x128xf32>
    %203 = arith.mulf %202, %201 : vector<8x128xf32>
    %cst_74 = arith.constant 5.000000e-01 : f32
    %204 = vector.broadcast %cst_74 : f32 to vector<8x128xf32>
    %205 = arith.addf %203, %204 : vector<8x128xf32>
    %206 = vector.extract_strided_slice %205 {offsets = [0, 32], sizes = [8, 32], strides = [1, 1]} : vector<8x128xf32> to vector<8x32xf32>
    %207 = arith.mulf %206, %189 : vector<8x32xf32>
    %208 = vector.extract_strided_slice %205 {offsets = [0, 0], sizes = [8, 32], strides = [1, 1]} : vector<8x128xf32> to vector<8x32xf32>
    %209 = vector.extract_strided_slice %201 {offsets = [0, 64], sizes = [8, 32], strides = [1, 1]} : vector<8x128xf32> to vector<8x32xf32>
    %210 = arith.mulf %208, %209 : vector<8x32xf32>
    %211 = arith.addf %207, %210 : vector<8x32xf32>
    %212 = vector.extract_strided_slice %205 {offsets = [0, 96], sizes = [8, 32], strides = [1, 1]} : vector<8x128xf32> to vector<8x32xf32>
    %213 = math.tanh %211 : vector<8x32xf32>
    %214 = arith.mulf %212, %213 : vector<8x32xf32>
    %c1_i32 = arith.constant 1 : i32
    %215 = vector.broadcast %c1_i32 : i32 to vector<8x1xi32>
    %216 = arith.cmpi eq, %174, %215 : vector<8x1xi32>
    %217 = vector.shape_cast %216 : vector<8x1xi1> to vector<8x1xi1>
    %218 = vector.broadcast %217 : vector<8x1xi1> to vector<8x32xi1>
    %219 = arith.select %218, %214, %197 : vector<8x32xi1>, vector<8x32xf32>
    %c16_75 = arith.constant 16 : index
    %c0_76 = arith.constant 0 : index
    %220 = vector.load %arg17[%c16_75, %c0_76] : memref<64x128xf32, #tpu.memory_space<vmem>>, vector<8x128xf32>
    %cst_77 = arith.constant dense<0.000000e+00> : vector<8x128xf32>
    %221 = tpu.matmul %214, %1, %cst_77 {dimension_numbers = #tpu.dot_dimension_numbers<[1], [0], [0], [1], [0, 0, 1, 1], [], []>} : vector<8x32xf32>, vector<32x128xf32>, vector<8x128xf32> -> vector<8x128xf32>
    %222 = arith.addf %220, %221 : vector<8x128xf32>
    %223 = math.tanh %222 : vector<8x128xf32>
    %cst_78 = arith.constant 5.000000e-01 : f32
    %224 = vector.broadcast %cst_78 : f32 to vector<8x128xf32>
    %225 = arith.mulf %224, %223 : vector<8x128xf32>
    %cst_79 = arith.constant 5.000000e-01 : f32
    %226 = vector.broadcast %cst_79 : f32 to vector<8x128xf32>
    %227 = arith.addf %225, %226 : vector<8x128xf32>
    %228 = vector.extract_strided_slice %227 {offsets = [0, 32], sizes = [8, 32], strides = [1, 1]} : vector<8x128xf32> to vector<8x32xf32>
    %229 = arith.mulf %228, %211 : vector<8x32xf32>
    %230 = vector.extract_strided_slice %227 {offsets = [0, 0], sizes = [8, 32], strides = [1, 1]} : vector<8x128xf32> to vector<8x32xf32>
    %231 = vector.extract_strided_slice %223 {offsets = [0, 64], sizes = [8, 32], strides = [1, 1]} : vector<8x128xf32> to vector<8x32xf32>
    %232 = arith.mulf %230, %231 : vector<8x32xf32>
    %233 = arith.addf %229, %232 : vector<8x32xf32>
    %234 = vector.extract_strided_slice %227 {offsets = [0, 96], sizes = [8, 32], strides = [1, 1]} : vector<8x128xf32> to vector<8x32xf32>
    %235 = math.tanh %233 : vector<8x32xf32>
    %236 = arith.mulf %234, %235 : vector<8x32xf32>
    %c2_i32 = arith.constant 2 : i32
    %237 = vector.broadcast %c2_i32 : i32 to vector<8x1xi32>
    %238 = arith.cmpi eq, %174, %237 : vector<8x1xi32>
    %239 = vector.shape_cast %238 : vector<8x1xi1> to vector<8x1xi1>
    %240 = vector.broadcast %239 : vector<8x1xi1> to vector<8x32xi1>
    %241 = arith.select %240, %236, %219 : vector<8x32xi1>, vector<8x32xf32>
    %c24_80 = arith.constant 24 : index
    %c0_81 = arith.constant 0 : index
    %242 = vector.load %arg17[%c24_80, %c0_81] : memref<64x128xf32, #tpu.memory_space<vmem>>, vector<8x128xf32>
    %cst_82 = arith.constant dense<0.000000e+00> : vector<8x128xf32>
    %243 = tpu.matmul %236, %1, %cst_82 {dimension_numbers = #tpu.dot_dimension_numbers<[1], [0], [0], [1], [0, 0, 1, 1], [], []>} : vector<8x32xf32>, vector<32x128xf32>, vector<8x128xf32> -> vector<8x128xf32>
    %244 = arith.addf %242, %243 : vector<8x128xf32>
    %245 = math.tanh %244 : vector<8x128xf32>
    %cst_83 = arith.constant 5.000000e-01 : f32
    %246 = vector.broadcast %cst_83 : f32 to vector<8x128xf32>
    %247 = arith.mulf %246, %245 : vector<8x128xf32>
    %cst_84 = arith.constant 5.000000e-01 : f32
    %248 = vector.broadcast %cst_84 : f32 to vector<8x128xf32>
    %249 = arith.addf %247, %248 : vector<8x128xf32>
    %250 = vector.extract_strided_slice %249 {offsets = [0, 32], sizes = [8, 32], strides = [1, 1]} : vector<8x128xf32> to vector<8x32xf32>
    %251 = arith.mulf %250, %233 : vector<8x32xf32>
    %252 = vector.extract_strided_slice %249 {offsets = [0, 0], sizes = [8, 32], strides = [1, 1]} : vector<8x128xf32> to vector<8x32xf32>
    %253 = vector.extract_strided_slice %245 {offsets = [0, 64], sizes = [8, 32], strides = [1, 1]} : vector<8x128xf32> to vector<8x32xf32>
    %254 = arith.mulf %252, %253 : vector<8x32xf32>
    %255 = arith.addf %251, %254 : vector<8x32xf32>
    %256 = vector.extract_strided_slice %249 {offsets = [0, 96], sizes = [8, 32], strides = [1, 1]} : vector<8x128xf32> to vector<8x32xf32>
    %257 = math.tanh %255 : vector<8x32xf32>
    %258 = arith.mulf %256, %257 : vector<8x32xf32>
    %c3_i32 = arith.constant 3 : i32
    %259 = vector.broadcast %c3_i32 : i32 to vector<8x1xi32>
    %260 = arith.cmpi eq, %174, %259 : vector<8x1xi32>
    %261 = vector.shape_cast %260 : vector<8x1xi1> to vector<8x1xi1>
    %262 = vector.broadcast %261 : vector<8x1xi1> to vector<8x32xi1>
    %263 = arith.select %262, %258, %241 : vector<8x32xi1>, vector<8x32xf32>
    %c32_85 = arith.constant 32 : index
    %c0_86 = arith.constant 0 : index
    %264 = vector.load %arg17[%c32_85, %c0_86] : memref<64x128xf32, #tpu.memory_space<vmem>>, vector<8x128xf32>
    %cst_87 = arith.constant dense<0.000000e+00> : vector<8x128xf32>
    %265 = tpu.matmul %258, %1, %cst_87 {dimension_numbers = #tpu.dot_dimension_numbers<[1], [0], [0], [1], [0, 0, 1, 1], [], []>} : vector<8x32xf32>, vector<32x128xf32>, vector<8x128xf32> -> vector<8x128xf32>
    %266 = arith.addf %264, %265 : vector<8x128xf32>
    %267 = math.tanh %266 : vector<8x128xf32>
    %cst_88 = arith.constant 5.000000e-01 : f32
    %268 = vector.broadcast %cst_88 : f32 to vector<8x128xf32>
    %269 = arith.mulf %268, %267 : vector<8x128xf32>
    %cst_89 = arith.constant 5.000000e-01 : f32
    %270 = vector.broadcast %cst_89 : f32 to vector<8x128xf32>
    %271 = arith.addf %269, %270 : vector<8x128xf32>
    %272 = vector.extract_strided_slice %271 {offsets = [0, 32], sizes = [8, 32], strides = [1, 1]} : vector<8x128xf32> to vector<8x32xf32>
    %273 = arith.mulf %272, %255 : vector<8x32xf32>
    %274 = vector.extract_strided_slice %271 {offsets = [0, 0], sizes = [8, 32], strides = [1, 1]} : vector<8x128xf32> to vector<8x32xf32>
    %275 = vector.extract_strided_slice %267 {offsets = [0, 64], sizes = [8, 32], strides = [1, 1]} : vector<8x128xf32> to vector<8x32xf32>
    %276 = arith.mulf %274, %275 : vector<8x32xf32>
    %277 = arith.addf %273, %276 : vector<8x32xf32>
    %278 = vector.extract_strided_slice %271 {offsets = [0, 96], sizes = [8, 32], strides = [1, 1]} : vector<8x128xf32> to vector<8x32xf32>
    %279 = math.tanh %277 : vector<8x32xf32>
    %280 = arith.mulf %278, %279 : vector<8x32xf32>
    %c4_i32 = arith.constant 4 : i32
    %281 = vector.broadcast %c4_i32 : i32 to vector<8x1xi32>
    %282 = arith.cmpi eq, %174, %281 : vector<8x1xi32>
    %283 = vector.shape_cast %282 : vector<8x1xi1> to vector<8x1xi1>
    %284 = vector.broadcast %283 : vector<8x1xi1> to vector<8x32xi1>
    %285 = arith.select %284, %280, %263 : vector<8x32xi1>, vector<8x32xf32>
    %c40_90 = arith.constant 40 : index
    %c0_91 = arith.constant 0 : index
    %286 = vector.load %arg17[%c40_90, %c0_91] : memref<64x128xf32, #tpu.memory_space<vmem>>, vector<8x128xf32>
    %cst_92 = arith.constant dense<0.000000e+00> : vector<8x128xf32>
    %287 = tpu.matmul %280, %1, %cst_92 {dimension_numbers = #tpu.dot_dimension_numbers<[1], [0], [0], [1], [0, 0, 1, 1], [], []>} : vector<8x32xf32>, vector<32x128xf32>, vector<8x128xf32> -> vector<8x128xf32>
    %288 = arith.addf %286, %287 : vector<8x128xf32>
    %289 = math.tanh %288 : vector<8x128xf32>
    %cst_93 = arith.constant 5.000000e-01 : f32
    %290 = vector.broadcast %cst_93 : f32 to vector<8x128xf32>
    %291 = arith.mulf %290, %289 : vector<8x128xf32>
    %cst_94 = arith.constant 5.000000e-01 : f32
    %292 = vector.broadcast %cst_94 : f32 to vector<8x128xf32>
    %293 = arith.addf %291, %292 : vector<8x128xf32>
    %294 = vector.extract_strided_slice %293 {offsets = [0, 32], sizes = [8, 32], strides = [1, 1]} : vector<8x128xf32> to vector<8x32xf32>
    %295 = arith.mulf %294, %277 : vector<8x32xf32>
    %296 = vector.extract_strided_slice %293 {offsets = [0, 0], sizes = [8, 32], strides = [1, 1]} : vector<8x128xf32> to vector<8x32xf32>
    %297 = vector.extract_strided_slice %289 {offsets = [0, 64], sizes = [8, 32], strides = [1, 1]} : vector<8x128xf32> to vector<8x32xf32>
    %298 = arith.mulf %296, %297 : vector<8x32xf32>
    %299 = arith.addf %295, %298 : vector<8x32xf32>
    %300 = vector.extract_strided_slice %293 {offsets = [0, 96], sizes = [8, 32], strides = [1, 1]} : vector<8x128xf32> to vector<8x32xf32>
    %301 = math.tanh %299 : vector<8x32xf32>
    %302 = arith.mulf %300, %301 : vector<8x32xf32>
    %c5_i32 = arith.constant 5 : i32
    %303 = vector.broadcast %c5_i32 : i32 to vector<8x1xi32>
    %304 = arith.cmpi eq, %174, %303 : vector<8x1xi32>
    %305 = vector.shape_cast %304 : vector<8x1xi1> to vector<8x1xi1>
    %306 = vector.broadcast %305 : vector<8x1xi1> to vector<8x32xi1>
    %307 = arith.select %306, %302, %285 : vector<8x32xi1>, vector<8x32xf32>
    %c48_95 = arith.constant 48 : index
    %c0_96 = arith.constant 0 : index
    %308 = vector.load %arg17[%c48_95, %c0_96] : memref<64x128xf32, #tpu.memory_space<vmem>>, vector<8x128xf32>
    %cst_97 = arith.constant dense<0.000000e+00> : vector<8x128xf32>
    %309 = tpu.matmul %302, %1, %cst_97 {dimension_numbers = #tpu.dot_dimension_numbers<[1], [0], [0], [1], [0, 0, 1, 1], [], []>} : vector<8x32xf32>, vector<32x128xf32>, vector<8x128xf32> -> vector<8x128xf32>
    %310 = arith.addf %308, %309 : vector<8x128xf32>
    %311 = math.tanh %310 : vector<8x128xf32>
    %cst_98 = arith.constant 5.000000e-01 : f32
    %312 = vector.broadcast %cst_98 : f32 to vector<8x128xf32>
    %313 = arith.mulf %312, %311 : vector<8x128xf32>
    %cst_99 = arith.constant 5.000000e-01 : f32
    %314 = vector.broadcast %cst_99 : f32 to vector<8x128xf32>
    %315 = arith.addf %313, %314 : vector<8x128xf32>
    %316 = vector.extract_strided_slice %315 {offsets = [0, 32], sizes = [8, 32], strides = [1, 1]} : vector<8x128xf32> to vector<8x32xf32>
    %317 = arith.mulf %316, %299 : vector<8x32xf32>
    %318 = vector.extract_strided_slice %315 {offsets = [0, 0], sizes = [8, 32], strides = [1, 1]} : vector<8x128xf32> to vector<8x32xf32>
    %319 = vector.extract_strided_slice %311 {offsets = [0, 64], sizes = [8, 32], strides = [1, 1]} : vector<8x128xf32> to vector<8x32xf32>
    %320 = arith.mulf %318, %319 : vector<8x32xf32>
    %321 = arith.addf %317, %320 : vector<8x32xf32>
    %322 = vector.extract_strided_slice %315 {offsets = [0, 96], sizes = [8, 32], strides = [1, 1]} : vector<8x128xf32> to vector<8x32xf32>
    %323 = math.tanh %321 : vector<8x32xf32>
    %324 = arith.mulf %322, %323 : vector<8x32xf32>
    %c6_i32 = arith.constant 6 : i32
    %325 = vector.broadcast %c6_i32 : i32 to vector<8x1xi32>
    %326 = arith.cmpi eq, %174, %325 : vector<8x1xi32>
    %327 = vector.shape_cast %326 : vector<8x1xi1> to vector<8x1xi1>
    %328 = vector.broadcast %327 : vector<8x1xi1> to vector<8x32xi1>
    %329 = arith.select %328, %324, %307 : vector<8x32xi1>, vector<8x32xf32>
    %c56_100 = arith.constant 56 : index
    %c0_101 = arith.constant 0 : index
    %330 = vector.load %arg17[%c56_100, %c0_101] : memref<64x128xf32, #tpu.memory_space<vmem>>, vector<8x128xf32>
    %cst_102 = arith.constant dense<0.000000e+00> : vector<8x128xf32>
    %331 = tpu.matmul %324, %1, %cst_102 {dimension_numbers = #tpu.dot_dimension_numbers<[1], [0], [0], [1], [0, 0, 1, 1], [], []>} : vector<8x32xf32>, vector<32x128xf32>, vector<8x128xf32> -> vector<8x128xf32>
    %332 = arith.addf %330, %331 : vector<8x128xf32>
    %333 = math.tanh %332 : vector<8x128xf32>
    %cst_103 = arith.constant 5.000000e-01 : f32
    %334 = vector.broadcast %cst_103 : f32 to vector<8x128xf32>
    %335 = arith.mulf %334, %333 : vector<8x128xf32>
    %cst_104 = arith.constant 5.000000e-01 : f32
    %336 = vector.broadcast %cst_104 : f32 to vector<8x128xf32>
    %337 = arith.addf %335, %336 : vector<8x128xf32>
    %338 = vector.extract_strided_slice %337 {offsets = [0, 32], sizes = [8, 32], strides = [1, 1]} : vector<8x128xf32> to vector<8x32xf32>
    %339 = arith.mulf %338, %321 : vector<8x32xf32>
    %340 = vector.extract_strided_slice %337 {offsets = [0, 0], sizes = [8, 32], strides = [1, 1]} : vector<8x128xf32> to vector<8x32xf32>
    %341 = vector.extract_strided_slice %333 {offsets = [0, 64], sizes = [8, 32], strides = [1, 1]} : vector<8x128xf32> to vector<8x32xf32>
    %342 = arith.mulf %340, %341 : vector<8x32xf32>
    %343 = arith.addf %339, %342 : vector<8x32xf32>
    %344 = vector.extract_strided_slice %337 {offsets = [0, 96], sizes = [8, 32], strides = [1, 1]} : vector<8x128xf32> to vector<8x32xf32>
    %345 = math.tanh %343 : vector<8x32xf32>
    %346 = arith.mulf %344, %345 : vector<8x32xf32>
    %c7_i32_105 = arith.constant 7 : i32
    %347 = vector.broadcast %c7_i32_105 : i32 to vector<8x1xi32>
    %348 = arith.cmpi eq, %174, %347 : vector<8x1xi32>
    %349 = vector.shape_cast %348 : vector<8x1xi1> to vector<8x1xi1>
    %350 = vector.broadcast %349 : vector<8x1xi1> to vector<8x32xi1>
    %351 = arith.select %350, %346, %329 : vector<8x32xi1>, vector<8x32xf32>
    %352 = tpu.concatenate %156, %351, %166 in 1 : vector<8x64xf32>, vector<8x32xf32>, vector<8x4xf32> -> vector<8x100xf32>
    %c0_106 = arith.constant 0 : index
    %c0_107 = arith.constant 0 : index
    %353 = vector.load %arg11[%c0_106, %c0_107] : memref<100x32xf32, #tpu.memory_space<vmem>>, vector<100x32xf32>
    %cst_108 = arith.constant dense<0.000000e+00> : vector<8x32xf32>
    %354 = tpu.matmul %352, %353, %cst_108 {dimension_numbers = #tpu.dot_dimension_numbers<[1], [0], [0], [1], [0, 0, 1, 1], [], []>} : vector<8x100xf32>, vector<100x32xf32>, vector<8x32xf32> -> vector<8x32xf32>
    %c0_109 = arith.constant 0 : index
    %c0_110 = arith.constant 0 : index
    %355 = vector.load %arg12[%c0_109, %c0_110] : memref<1x32xf32, #tpu.memory_space<vmem>>, vector<1x32xf32>
    %356 = vector.broadcast %355 : vector<1x32xf32> to vector<8x32xf32>
    %357 = arith.addf %354, %356 : vector<8x32xf32>
    %cst_111 = arith.constant 0.000000e+00 : f32
    %358 = vector.broadcast %cst_111 : f32 to vector<8x32xf32>
    %359 = arith.maximumf %357, %358 : vector<8x32xf32>
    %c0_112 = arith.constant 0 : index
    %c0_113 = arith.constant 0 : index
    %360 = vector.load %arg13[%c0_112, %c0_113] : memref<32x12xf32, #tpu.memory_space<vmem>>, vector<32x12xf32>
    %cst_114 = arith.constant dense<0.000000e+00> : vector<8x12xf32>
    %361 = tpu.matmul %359, %360, %cst_114 {dimension_numbers = #tpu.dot_dimension_numbers<[1], [0], [0], [1], [0, 0, 1, 1], [], []>} : vector<8x32xf32>, vector<32x12xf32>, vector<8x12xf32> -> vector<8x12xf32>
    %c0_115 = arith.constant 0 : index
    %c0_116 = arith.constant 0 : index
    %362 = vector.load %arg14[%c0_115, %c0_116] : memref<1x12xf32, #tpu.memory_space<vmem>>, vector<1x12xf32>
    %363 = vector.broadcast %362 : vector<1x12xf32> to vector<8x12xf32>
    %364 = arith.addf %361, %363 : vector<8x12xf32>
    %c0_117 = arith.constant 0 : index
    %c0_118 = arith.constant 0 : index
    %365 = vector.load %arg15[%c0_117, %c0_118] : memref<8x12xf32, #tpu.memory_space<vmem>>, vector<8x12xf32>
    tpu.vector_store %arg15[%c0_117, %c0_118], %364 {strides = array<i32>} : memref<8x12xf32, #tpu.memory_space<vmem>>, vector<8x12xf32>,
    return
  }
}

</mosaic_0001>

<bundles_post_ra>
// kernel: _block_forward_impl.1
= control target key start
LH: loop header
LB: loop body
LE: loop exit
PB: predicated region body
PF: predicated region fallthrough
CT: control target
= control target key end

     0   :  { %vm111_vm0 = vcmask 1045504   ;;  %vm86_vm1 = vcmask 48128   ;;  %v1551_v20 = vmov 0.0   ;;  %vm309_vm2 = vcmask 523264   ;;  %s2278_s3 = inlined_call_operand.vmem [shape: f32[6,256], index: 3, kind: input, shape index: {}]   ;;  %s2279_s4 = inlined_call_operand.vmem [shape: f32[64,256], index: 4, kind: input, shape index: {}]   ;;  %s2280_s0 = inlined_call_operand.vmem [shape: f32[64,6], index: 0, kind: input, shape index: {}]   ;;  %s2281_s5 = inlined_call_operand.vmem [shape: f32[1,256], index: 5, kind: input, shape index: {}]   ;;  %s2282_s10 = inlined_call_operand.vmem [shape: f32[1,128], index: 10, kind: input, shape index: {}]   ;;  %s2283_s8 = inlined_call_operand.vmem [shape: f32[2,128], index: 8, kind: input, shape index: {}]   ;;  %s2284_s1 = inlined_call_operand.vmem [shape: f32[64,2], index: 1, kind: input, shape index: {}]   ;;  %s2285_s6 = inlined_call_operand.vmem [shape: f32[128,64], index: 6, kind: input, shape index: {}]   ;;  %s2286_s7 = inlined_call_operand.vmem [shape: f32[1,64], index: 7, kind: input, shape index: {}]   ;;  %s2287_s9 = inlined_call_operand.vmem [shape: f32[32,128], index: 9, kind: input, shape index: {}]   ;;  %s2288_s2 = inlined_call_operand.vmem [shape: f32[8,4], index: 2, kind: input, shape index: {}]   ;;  %s2289_s11 = inlined_call_operand.vmem [shape: f32[100,32], index: 11, kind: input, shape index: {}]   ;;  %s2290_s12 = inlined_call_operand.vmem [shape: f32[1,32], index: 12, kind: input, shape index: {}]   ;;  %s2291_s13 = inlined_call_operand.vmem [shape: f32[32,12], index: 13, kind: input, shape index: {}]   ;;  %s2292_s14 = inlined_call_operand.vmem [shape: f32[1,12], index: 14, kind: input, shape index: {}]   ;;  %s2293_s15 = inlined_call_operand.vmem [shape: f32[8,12], index: 15, kind: output, shape index: {}]  }
   0x1   :  { %v79_v0 = vld [vmem:[%s2278_s3 + $0x8] sm:$0x3f]  ;;  %v1643_v1 = vld [vmem:[%s2279_s4 + $0x70] sm:$0xff]  ;;  %v1649_v2 = vld [vmem:[%s2279_s4 + $0x60] sm:$0xff]  ;;  %vm254_vm3 = vcmask 1041408   ;;  %vm229_vm4 = vcmask 15360  }
   0x2   :  { %1450 = vmatpush.msk.msra.mxu3 %vm111_vm0, %v79_v0  ;;  %v1654_v3 = vld [vmem:[%s2280_s0 + $0x30] sm:$0xff]  ;;  %1407 = vmatpush.msk.msra.mxu1 %vm111_vm0, %v79_v0  ;;  %v1668_v5 = vld [vmem:[%s2279_s4 + $0x78] sm:$0xff]  ;;  %v1675_v6 = vld [vmem:[%s2279_s4 + $0x40] sm:$0xff]  ;;  %vm823_vm5 = vcmask 261120  }
   0x3   :  { %v1661_v4 = vld [vmem:[%s2279_s4 + $0x50] sm:$0xff]  ;;  %1414 = vmatmul.msk.f32.vlgmr.msra.gmra.mxu3 %vm86_vm1, %v1654_v3  ;;  %v78_v7 = vld [vmem:[%s2278_s3] sm:$0x3f]  ;;  %v1696_v10 = vld [vmem:[%s2280_s0 + $0x38] sm:$0xff] }
   0x4   :  { %321 = vmatpush.msrb.mxu3 %v1643_v1  ;;  %469 = vmatpush.msrb.mxu1 %v1668_v5  ;;  %v70_v8 = vld [vmem:[%s2280_s0] sm:$0xff]  ;;  %v1688_v9 = vld [vmem:[%s2279_s4 + $0x30] sm:$0xff]  ;;  %v1701_v11 = vld [vmem:[%s2279_s4 + $0x68] sm:$0xff] }
   0x5   :  { %1398 = vmatpush.msk.msra.mxu0 %vm111_vm0, %v78_v7  ;;  %1408 = vmatmul.msk.f32.vlgmr.msra.gmra.mxu1 %vm86_vm1, %v70_v8  ;;  %v1707_v12 = vld [vmem:[%s2279_s4 + $0x20] sm:$0xff]  ;;  %v1714_v13 = vld [vmem:[%s2279_s4 + $0x58] sm:$0xff]  ;;  %v1720_v14 = vld [vmem:[%s2279_s4 + $0x10] sm:$0xff] }
   0x6   :  { %322 = vmatpush.msrb.mxu3 %v1649_v2  ;;  %1399 = vmatmul.msk.f32.vlgmr.msra.gmra.mxu0 %vm86_vm1, %v70_v8  ;;  %v1729_v15 = vld [vmem:[%s2279_s4 + $0x48] sm:$0xff]  ;;  %v1735_v16 = vld [vmem:[%s2279_s4] sm:$0xff]  ;;  %v1742_v17 = vld [vmem:[%s2279_s4 + $0x38] sm:$0xff] }
   0x7   :  { %449 = vmatpush.msrb.mxu0 %v1643_v1  ;;  %470 = vmatpush.msrb.mxu1 %v1701_v11  ;;  %v1750_v18 = vld [vmem:[%s2279_s4 + $0x28] sm:$0xff]  ;;  %v1758_v19 = vld [vmem:[%s2279_s4 + $0x18] sm:$0xff]  ;;  %v80_v24 = vld [vmem:[%s2281_s5] sm:$0x3]  ;;  %s1552_s5 = smov 64  }
   0x8   :  { %323 = vmatpush.msrb.mxu3 %v1661_v4  ;;  %v1766_v21 = vld [vmem:[%s2279_s4 + $0x8] sm:$0xff]  ;;  %v1816_v25 = vperm.slane %v80_v24, 0  ;;  %v1819_v31 = vperm.slane %v80_v24, 1  ;;  %v72_v62 = vld [vmem:[%s2280_s0 + $0x10] sm:$0xff]  ;;  %v73_v63 = vld [vmem:[%s2280_s0 + $0x18] sm:$0xff] }
   0x9   :  { %450 = vmatpush.msrb.mxu0 %v1649_v2  ;;  %471 = vmatpush.msrb.mxu1 %v1714_v13  ;;  %v71_v47 = vld [vmem:[%s2280_s0 + $0x8] sm:$0xff]  ;;  %v74_v0 = vld [vmem:[%s2280_s0 + $0x20] sm:$0xff] }
   0xa   :  { %324 = vmatpush.msrb.mxu3 %v1675_v6  ;;  %v75_v24 = vld [vmem:[%s2280_s0 + $0x28] sm:$0xff] }
   0xb   :  { %1415 = vmatmul.msk.f32.gmra.mxu3 %vm86_vm1, %v1696_v10  ;;  %451 = vmatpush.msrb.mxu0 %v1661_v4 }
   0xc   :  { %325 = vmatpush.msrb.mxu3 %v1688_v9  ;;  %472 = vmatpush.msrb.mxu1 %v1729_v15 }
   0xd   :  { %452 = vmatpush.msrb.mxu0 %v1675_v6  ;;  %1409 = vmatmul.msk.f32.gmra.mxu1 %vm86_vm1, %v71_v47 }
   0xe   :  { %326 = vmatpush.msrb.mxu3 %v1707_v12  ;;  %473 = vmatpush.msrb.mxu1 %v1742_v17 }
   0xf   :  { %453 = vmatpush.msrb.mxu0 %v1688_v9 }
  0x10   :  { %327 = vmatpush.msrb.mxu3 %v1720_v14  ;;  %474 = vmatpush.msrb.mxu1 %v1750_v18 }
  0x11   :  { %454 = vmatpush.msrb.mxu0 %v1707_v12 }
  0x12   :  { %328 = vmatpush.msrb.mxu3 %v1735_v16  ;;  %475 = vmatpush.msrb.mxu1 %v1758_v19 }
  0x13   :  { %329 = vmatmul.f32.vlgmr.msrb.gmra.mxu3 %v1551_v20  ;;  %455 = vmatpush.msrb.mxu0 %v1720_v14 }
  0x14   :  { %341 = vmatpush.msra.mxu3 %v1668_v5  ;;  %476 = vmatpush.msrb.mxu1 %v1766_v21 }
  0x15   :  { %456 = vmatpush.msrb.mxu0 %v1735_v16  ;;  %1410 = vmatmul.msk.f32.gmra.mxu1 %vm86_vm1, %v72_v62 }
  0x16   :  { %342 = vmatpush.msra.mxu3 %v1701_v11  ;;  %597 = vmatpush.msra.mxu1 %v1668_v5 }
  0x17   :  { %577 = vmatpush.msra.mxu0 %v1643_v1 }
  0x18   :  { %343 = vmatpush.msra.mxu3 %v1714_v13  ;;  %598 = vmatpush.msra.mxu1 %v1701_v11 }
  0x19   :  { %578 = vmatpush.msra.mxu0 %v1649_v2 }
  0x1a   :  { %344 = vmatpush.msra.mxu3 %v1729_v15  ;;  %599 = vmatpush.msra.mxu1 %v1714_v13 }
  0x1b   :  { %579 = vmatpush.msra.mxu0 %v1661_v4 }
  0x1c   :  { %345 = vmatpush.msra.mxu3 %v1742_v17  ;;  %600 = vmatpush.msra.mxu1 %v1729_v15 }
  0x1d   :  { %580 = vmatpush.msra.mxu0 %v1675_v6  ;;  %1411 = vmatmul.msk.f32.gmra.mxu1 %vm86_vm1, %v73_v63 }
  0x1e   :  { %346 = vmatpush.msra.mxu3 %v1750_v18  ;;  %601 = vmatpush.msra.mxu1 %v1742_v17 }
  0x1f   :  { %581 = vmatpush.msra.mxu0 %v1688_v9 }
  0x20   :  { %347 = vmatpush.msra.mxu3 %v1758_v19  ;;  %602 = vmatpush.msra.mxu1 %v1750_v18 }
  0x21   :  { %582 = vmatpush.msra.mxu0 %v1707_v12 }
  0x22   :  { %348 = vmatpush.msra.mxu3 %v1766_v21  ;;  %603 = vmatpush.msra.mxu1 %v1758_v19 }
  0x23   :  { %349 = vmatmul.f32.vlgmr.msra.gmra.mxu3 %v1551_v20  ;;  %583 = vmatpush.msra.mxu0 %v1720_v14 }
  0x24   :  { %385 = vmatpush.msrb.mxu3 %v1643_v1  ;;  %604 = vmatpush.msra.mxu1 %v1766_v21 }
  0x25   :  { %584 = vmatpush.msra.mxu0 %v1735_v16  ;;  %1412 = vmatmul.msk.f32.gmra.mxu1 %vm86_vm1, %v74_v0 }
  0x26   :  { %386 = vmatpush.msrb.mxu3 %v1649_v2  ;;  %1400 = vmatmul.msk.f32.gmra.mxu0 %vm86_vm1, %v71_v47 }
  0x28   :  { %387 = vmatpush.msrb.mxu3 %v1661_v4 }
  0x2a   :  { %388 = vmatpush.msrb.mxu3 %v1675_v6 }
  0x2c   :  { %389 = vmatpush.msrb.mxu3 %v1688_v9 }
  0x2d   :  { %1413 = vmatmul.msk.f32.gmra.mxu1 %vm86_vm1, %v75_v24 }
  0x2e   :  { %390 = vmatpush.msrb.mxu3 %v1707_v12  ;;  %1401 = vmatmul.msk.f32.gmra.mxu0 %vm86_vm1, %v72_v62 }
  0x30   :  { %391 = vmatpush.msrb.mxu3 %v1720_v14 }
  0x32   :  { %392 = vmatpush.msrb.mxu3 %v1735_v16 }
  0x34   :  { %405 = vmatpush.msra.mxu3 %v1668_v5 }
  0x36   :  { %406 = vmatpush.msra.mxu3 %v1701_v11  ;;  %1402 = vmatmul.msk.f32.gmra.mxu0 %vm86_vm1, %v73_v63 }
  0x38   :  { %407 = vmatpush.msra.mxu3 %v1714_v13 }
  0x3a   :  { %408 = vmatpush.msra.mxu3 %v1729_v15 }
  0x3c   :  { %409 = vmatpush.msra.mxu3 %v1742_v17 }
  0x3e   :  { %410 = vmatpush.msra.mxu3 %v1750_v18  ;;  %1403 = vmatmul.msk.f32.gmra.mxu0 %vm86_vm1, %v74_v0  ;;  %v220_v0 = vld [vmem:[%s2284_s1 + $0x20] sm:$0xff] }
  0x40   :  { %411 = vmatpush.msra.mxu3 %v1758_v19 }
  0x42   :  { %412 = vmatpush.msra.mxu3 %v1766_v21 }
  0x46   :  { %1404 = vmatmul.msk.f32.gmra.mxu0 %vm86_vm1, %v75_v24 }
  0x4e   :  { %1405 = vmatmul.msk.f32.gmra.mxu0 %vm86_vm1, %v1654_v3 }
  0x56   :  { %1406 = vmatmul.msk.f32.gmra.mxu0 %vm86_vm1, %v1696_v10  ;;  %vm1336_vm1 = vcmask 1043456  }
  0x82   :  { %v176_v30 = vpop.f32.mrf.mxu1 }
  0x83   :  { %v135_v26 = vpop.f32.mrf.mxu0  ;;  %v177_v32 = vadd.f32 %v176_v30, %v1819_v31 }
  0x84   :  { %v136_v27 = vadd.f32 %v135_v26, %v1816_v25 }
  0x86   :  { %v1809_v22 = vpop.f32.mrf.mxu3 }
  0x8a   :  { %v179_v53 = vpop.f32.mrf.mxu1 }
  0x8b   :  { %v180_v54 = vadd.f32 %v179_v53, %v1819_v31  ;;  %v216_v53 = vld [vmem:[%s2284_s1] sm:$0xff] }
  0x8e   :  { %v1811_v23 = vpop.f32.mrf.mxu3 }
  0x96   :  { %v330_v28 = vpop.f32.mrf.mxu3 }
  0x97   :  { %v353_v29 = vadd.f32 %v330_v28, %v136_v27 }
  0x99   :  { %1469 = vtanh.f32 %v353_v29 }
  0x9f   :  { %v1470_v34 = vpop.eup %1469 }
  0xa0   :  { %v357_v36 = vmul.f32 0.5, %v1470_v34 }
  0xa2   :  { %v359_v37 = vadd.f32 0.5, %v357_v36 }
  0xa3   :  { %v138_v49 = vpop.f32.mrf.mxu0 }
  0xa4   :  { %v361_v40 = vmul.f32 0.0, %v359_v37  ;;  %v139_v50 = vadd.f32 %v138_v49, %v1816_v25 }
  0xa6   :  { %v350_v33 = vpop.f32.mrf.mxu3 }
  0xa7   :  { %v354_v35 = vadd.f32 %v350_v33, %v177_v32  ;;  %v182_v33 = vpop.f32.mrf.mxu1 }
  0xa9   :  { %1471 = vtanh.f32 %v354_v35 }
  0xab   :  { %v141_v3 = vpop.f32.mrf.mxu0 }
  0xaf   :  { %v1472_v38 = vpop.eup %1471  ;;  %v1906_v35 = vpop.f32.mrf.mxu1 }
  0xb0   :  { %v362_v39 = vmul.f32 %v1472_v38, %v359_v37  ;;  %v358_v43 = vmul.f32 0.5, %v1472_v38 }
  0xb2   :  { %364 = vrot.lane.b32.xlu0 %v362_v39, %s1552_s5  ;;  %v360_v44 = vadd.f32 0.5, %v358_v43  ;;  %v183_v43 = vadd.f32 %v182_v33, %v1819_v31 }
  0xb3   :  { %v1900_v10 = vpop.f32.mrf.mxu0 }
  0xb7   :  { %v1910_v37 = vpop.f32.mrf.mxu1 }
  0xbb   :  { %v1902_v32 = vpop.f32.mrf.mxu0 }
  0xbf   :  { %v1914_v39 = vpop.f32.mrf.mxu1 }
  0xc3   :  { %v1904_v34 = vpop.f32.mrf.mxu0 }
  0xcb   :  { %v1908_v36 = vpop.f32.mrf.mxu0 }
  0xd3   :  { %v1912_v38 = vpop.f32.mrf.mxu0 }
 0x124   :  { %v365_v41 = vpop.permute.xlu0 %364 }
 0x125   :  { %v367_v42 = vadd.f32 %v365_v41, %v361_v40  ;;  %v142_v40 = vadd.f32 %v141_v3, %v1816_v25 }
 0x127   :  { %1473 = vtanh.f32 %v367_v42 }
 0x12d   :  { %v1474_v45 = vpop.eup %1473 }
 0x12e   :  { %v369_v46 = vmul.f32 %v1474_v45, %v360_v44 }
 0x130   :  { %373 = vrot.lane.b32.xlu0 %v369_v46, %s1552_s5 }
 0x1a2   :  { %v1829_v48 = vpop.permute.xlu0 %373 }
 0x1a3   :  { %1425 = vmatmul.msk.f32.vlgmr.msrb.gmra.mxu3 %vm309_vm2, %v1829_v48 }
 0x1a4   :  { %533 = vmatpush.msrb.mxu3 %v1668_v5 }
 0x1a6   :  { %534 = vmatpush.msrb.mxu3 %v1701_v11 }
 0x1a8   :  { %535 = vmatpush.msrb.mxu3 %v1714_v13 }
 0x1aa   :  { %536 = vmatpush.msrb.mxu3 %v1729_v15 }
 0x1ab   :  { %1426 = vmatmul.msk.f32.vlgmr.msra.gmra.mxu3 %vm309_vm2, %v1829_v48 }
 0x1ac   :  { %537 = vmatpush.msrb.mxu3 %v1742_v17 }
 0x1ae   :  { %538 = vmatpush.msrb.mxu3 %v1750_v18 }
 0x1b0   :  { %539 = vmatpush.msrb.mxu3 %v1758_v19 }
 0x1b2   :  { %540 = vmatpush.msrb.mxu3 %v1766_v21 }
 0x1b4   :  { %661 = vmatpush.msra.mxu3 %v1668_v5 }
 0x1b6   :  { %662 = vmatpush.msra.mxu3 %v1701_v11 }
 0x1b8   :  { %663 = vmatpush.msra.mxu3 %v1714_v13 }
 0x1ba   :  { %664 = vmatpush.msra.mxu3 %v1729_v15 }
 0x1bc   :  { %665 = vmatpush.msra.mxu3 %v1742_v17 }
 0x1be   :  { %666 = vmatpush.msra.mxu3 %v1750_v18 }
 0x1c0   :  { %667 = vmatpush.msra.mxu3 %v1758_v19 }
 0x1c2   :  { %668 = vmatpush.msra.mxu3 %v1766_v21 }
 0x226   :  { %v394_v51 = vpop.f32.mrf.mxu3 }
 0x227   :  { %v417_v52 = vadd.f32 %v394_v51, %v139_v50 }
 0x229   :  { %1475 = vtanh.f32 %v417_v52  ;;  %v224_v52 = vld [vmem:[%s2283_s8] sm:$0x3] }
 0x22a   :  { %1416 = vmatpush.msk.msra.mxu2 %vm254_vm3, %v224_v52 }
 0x22b   :  { %1417 = vmatmul.msk.f32.vlgmr.msra.gmra.mxu2 %vm229_vm4, %v216_v53 }
 0x22c   :  { %513 = vmatpush.msrb.mxu2 %v1643_v1 }
 0x22e   :  { %v414_v55 = vpop.f32.mrf.mxu3  ;;  %514 = vmatpush.msrb.mxu2 %v1649_v2 }
 0x22f   :  { %v1476_v56 = vpop.eup %1475  ;;  %v418_v57 = vadd.f32 %v414_v55, %v180_v54  ;;  %v217_v54 = vld [vmem:[%s2284_s1 + $0x8] sm:$0xff]  ;;  %v218_v55 = vld [vmem:[%s2284_s1 + $0x10] sm:$0xff] }
 0x230   :  { %v421_v58 = vmul.f32 0.5, %v1476_v56  ;;  %515 = vmatpush.msrb.mxu2 %v1661_v4 }
 0x231   :  { %1477 = vtanh.f32 %v418_v57 }
 0x232   :  { %v423_v59 = vadd.f32 0.5, %v421_v58  ;;  %516 = vmatpush.msrb.mxu2 %v1675_v6 }
 0x233   :  { %1418 = vmatmul.msk.f32.gmra.mxu2 %vm229_vm4, %v217_v54  ;;  %v189_v54 = vadd.f32 %v1910_v37, %v1819_v31 }
 0x234   :  { %v425_v7 = vmul.f32 %v423_v59, %v367_v42  ;;  %517 = vmatpush.msrb.mxu2 %v1688_v9 }
 0x236   :  { %518 = vmatpush.msrb.mxu2 %v1707_v12 }
 0x237   :  { %v1478_v60 = vpop.eup %1477 }
 0x238   :  { %v426_v61 = vmul.f32 %v1478_v60, %v423_v59  ;;  %v422_v26 = vmul.f32 0.5, %v1478_v60  ;;  %519 = vmatpush.msrb.mxu2 %v1720_v14  ;;  %v219_v59 = vld [vmem:[%s2284_s1 + $0x18] sm:$0xff] }
 0x23a   :  { %428 = vrot.lane.b32.xlu1 %v426_v61, %s1552_s5  ;;  %v424_v27 = vadd.f32 0.5, %v422_v26  ;;  %520 = vmatpush.msrb.mxu2 %v1735_v16 }
 0x23b   :  { %1419 = vmatmul.msk.f32.gmra.mxu2 %vm229_vm4, %v218_v55 }
 0x23c   :  { %641 = vmatpush.msra.mxu2 %v1643_v1 }
 0x23e   :  { %642 = vmatpush.msra.mxu2 %v1649_v2 }
 0x240   :  { %643 = vmatpush.msra.mxu2 %v1661_v4 }
 0x242   :  { %644 = vmatpush.msra.mxu2 %v1675_v6 }
 0x243   :  { %1420 = vmatmul.msk.f32.gmra.mxu2 %vm229_vm4, %v219_v59 }
 0x244   :  { %645 = vmatpush.msra.mxu2 %v1688_v9 }
 0x246   :  { %646 = vmatpush.msra.mxu2 %v1707_v12 }
 0x248   :  { %647 = vmatpush.msra.mxu2 %v1720_v14 }
 0x24a   :  { %648 = vmatpush.msra.mxu2 %v1735_v16 }
 0x24b   :  { %1421 = vmatmul.msk.f32.gmra.mxu2 %vm229_vm4, %v220_v0 }
 0x2ac   :  { %v429_v8 = vpop.permute.xlu1 %428 }
 0x2ad   :  { %v1869_v20 = vadd.f32 %v429_v8, %v425_v7  ;;  %v221_v7 = vld [vmem:[%s2284_s1 + $0x28] sm:$0xff]  ;;  %v222_v8 = vld [vmem:[%s2284_s1 + $0x30] sm:$0xff] }
 0x2ae   :  { %1422 = vmatmul.msk.f32.gmra.mxu2 %vm229_vm4, %v221_v7  ;;  %v1987_v26 = vpop.f32.mrf.mxu2 }
 0x2af   :  { %1479 = vtanh.f32 %v1869_v20 }
 0x2b5   :  { %v1480_v28 = vpop.eup %1479 }
 0x2b6   :  { %v433_v29 = vmul.f32 %v1480_v28, %v424_v27  ;;  %1423 = vmatmul.msk.f32.gmra.mxu2 %vm229_vm4, %v222_v8 }
 0x2b8   :  { %437 = vrot.lane.b32.xlu1 %v433_v29, %s1552_s5  ;;  %v186_v29 = vadd.f32 %v1906_v35, %v1819_v31 }
 0x32a   :  { %v438_v30 = vpop.permute.xlu1 %437 }
 0x32b   :  { %1427 = vmatmul.msk.f32.vlgmr.msrb.gmra.mxu0 %vm309_vm2, %v438_v30  ;;  %1428 = vmatmul.msk.f32.vlgmr.msrb.gmra.mxu1 %vm309_vm2, %v438_v30 }
 0x32c   :  { %705 = vmatpush.msrb.mxu0 %v1643_v1  ;;  %725 = vmatpush.msrb.mxu1 %v1668_v5 }
 0x32e   :  { %706 = vmatpush.msrb.mxu0 %v1649_v2  ;;  %726 = vmatpush.msrb.mxu1 %v1701_v11 }
 0x330   :  { %707 = vmatpush.msrb.mxu0 %v1661_v4  ;;  %727 = vmatpush.msrb.mxu1 %v1714_v13 }
 0x332   :  { %708 = vmatpush.msrb.mxu0 %v1675_v6  ;;  %728 = vmatpush.msrb.mxu1 %v1729_v15 }
 0x334   :  { %709 = vmatpush.msrb.mxu0 %v1688_v9  ;;  %729 = vmatpush.msrb.mxu1 %v1742_v17 }
 0x336   :  { %710 = vmatpush.msrb.mxu0 %v1707_v12  ;;  %730 = vmatpush.msrb.mxu1 %v1750_v18 }
 0x338   :  { %711 = vmatpush.msrb.mxu0 %v1720_v14  ;;  %731 = vmatpush.msrb.mxu1 %v1758_v19 }
 0x33a   :  { %712 = vmatpush.msrb.mxu0 %v1735_v16  ;;  %732 = vmatpush.msrb.mxu1 %v1766_v21 }
 0x3a8   :  { %v458_v41 = vpop.f32.mrf.mxu0  ;;  %v478_v42 = vpop.f32.mrf.mxu1 }
 0x3a9   :  { %v481_v44 = vadd.f32 %v458_v41, %v142_v40  ;;  %v482_v45 = vadd.f32 %v478_v42, %v183_v43 }
 0x3ab   :  { %1481 = vtanh.f32 %v481_v44 }
 0x3ac   :  { %1483 = vtanh.f32 %v482_v45 }
 0x3b1   :  { %v1482_v46 = vpop.eup %1481 }
 0x3b2   :  { %v485_v47 = vmul.f32 0.5, %v1482_v46  ;;  %v1484_v50 = vpop.eup %1483 }
 0x3b3   :  { %v486_v60 = vmul.f32 0.5, %v1484_v50 }
 0x3b4   :  { %v487_v49 = vadd.f32 0.5, %v485_v47 }
 0x3b5   :  { %v488_v61 = vadd.f32 0.5, %v486_v60 }
 0x3b6   :  { %v490_v51 = vmul.f32 %v1484_v50, %v487_v49  ;;  %v489_v56 = vmul.f32 %v487_v49, %v1869_v20  ;;  %v223_v20 = vld [vmem:[%s2284_s1 + $0x38] sm:$0xff] }
 0x3b7   :  { %1424 = vmatmul.msk.f32.gmra.mxu2 %vm229_vm4, %v223_v20 }
 0x3b8   :  { %492 = vrot.lane.b32.xlu2 %v490_v51, %s1552_s5  ;;  %v148_v51 = vadd.f32 %v1902_v32, %v1816_v25 }
 0x412   :  { %v493_v57 = vpop.permute.xlu2 %492 }
 0x413   :  { %v1944_v58 = vadd.f32 %v493_v57, %v489_v56 }
 0x415   :  { %1485 = vtanh.f32 %v1944_v58 }
 0x41b   :  { %v1486_v62 = vpop.eup %1485 }
 0x41c   :  { %v497_v63 = vmul.f32 %v1486_v62, %v488_v61 }
 0x41e   :  { %501 = vrot.lane.b32.xlu2 %v497_v63, %s1552_s5 }
 0x478   :  { %v502_v24 = vpop.permute.xlu2 %501 }
 0x479   :  { %1429 = vmatmul.msk.f32.vlgmr.msrb.gmra.mxu2 %vm309_vm2, %v502_v24  ;;  %1430 = vmatmul.msk.f32.vlgmr.msrb.gmra.mxu3 %vm309_vm2, %v502_v24  ;;  %v151_v24 = vadd.f32 %v1904_v34, %v1816_v25 }
 0x47a   :  { %769 = vmatpush.msrb.mxu2 %v1643_v1  ;;  %789 = vmatpush.msrb.mxu3 %v1668_v5  ;;  %v1998_v1 = vld [vmem:[%s2282_s10] ss:$0 sm:$0xff] }
 0x47c   :  { %770 = vmatpush.msrb.mxu2 %v1649_v2  ;;  %790 = vmatpush.msrb.mxu3 %v1701_v11  ;;  %v278_v2 = vpop.f32.mrf.mxu2 }
 0x47e   :  { %771 = vmatpush.msrb.mxu2 %v1661_v4  ;;  %791 = vmatpush.msrb.mxu3 %v1714_v13  ;;  %v2001_v4 = vadd.f32 %v1998_v1, %v278_v2 }
 0x480   :  { %772 = vmatpush.msrb.mxu2 %v1675_v6  ;;  %792 = vmatpush.msrb.mxu3 %v1729_v15 }
 0x482   :  { %773 = vmatpush.msrb.mxu2 %v1688_v9  ;;  %793 = vmatpush.msrb.mxu3 %v1742_v17 }
 0x484   :  { %774 = vmatpush.msrb.mxu2 %v1707_v12  ;;  %794 = vmatpush.msrb.mxu3 %v1750_v18  ;;  %v281_v5 = vpop.f32.mrf.mxu2 }
 0x485   :  { %v2004_v6 = vadd.f32 %v1998_v1, %v281_v5 }
 0x486   :  { %775 = vmatpush.msrb.mxu2 %v1720_v14  ;;  %795 = vmatpush.msrb.mxu3 %v1758_v19 }
 0x488   :  { %776 = vmatpush.msrb.mxu2 %v1735_v16  ;;  %796 = vmatpush.msrb.mxu3 %v1766_v21  ;;  %v145_v21 = vadd.f32 %v1900_v10, %v1816_v25 }
 0x48c   :  { %v284_v9 = vpop.f32.mrf.mxu2 }
 0x48d   :  { %v2007_v11 = vadd.f32 %v1998_v1, %v284_v9  ;;  %v192_v9 = vadd.f32 %v1914_v39, %v1819_v31 }
 0x494   :  { %v287_v12 = vpop.f32.mrf.mxu2 }
 0x495   :  { %v2010_v13 = vadd.f32 %v1998_v1, %v287_v12 }
 0x49c   :  { %v290_v14 = vpop.f32.mrf.mxu2 }
 0x49d   :  { %v2013_v15 = vadd.f32 %v1998_v1, %v290_v14 }
 0x4a4   :  { %v293_v16 = vpop.f32.mrf.mxu2 }
 0x4a5   :  { %v2016_v17 = vadd.f32 %v1998_v1, %v293_v16 }
 0x4ac   :  { %v296_v18 = vpop.f32.mrf.mxu2 }
 0x4ad   :  { %v2019_v19 = vadd.f32 %v1998_v1, %v296_v18 }
 0x4fc   :  { %v522_v27 = vpop.f32.mrf.mxu2  ;;  %v542_v28 = vpop.f32.mrf.mxu3 }
 0x4fd   :  { %v545_v30 = vadd.f32 %v522_v27, %v145_v21  ;;  %v546_v3 = vadd.f32 %v542_v28, %v186_v29 }
 0x4ff   :  { %1487 = vtanh.f32 %v545_v30 }
 0x500   :  { %1489 = vtanh.f32 %v546_v3 }
 0x505   :  { %v1488_v33 = vpop.eup %1487 }
 0x506   :  { %v549_v40 = vmul.f32 0.5, %v1488_v33  ;;  %v1490_v42 = vpop.eup %1489 }
 0x507   :  { %v550_v46 = vmul.f32 0.5, %v1490_v42 }
 0x508   :  { %v551_v41 = vadd.f32 0.5, %v549_v40 }
 0x509   :  { %v552_v47 = vadd.f32 0.5, %v550_v46 }
 0x50a   :  { %v554_v43 = vmul.f32 %v1490_v42, %v551_v41  ;;  %v553_v44 = vmul.f32 %v551_v41, %v1944_v58  ;;  %v154_v42 = vadd.f32 %v1908_v36, %v1816_v25 }
 0x50c   :  { %556 = vrot.lane.b32.xlu0 %v554_v43, %s1552_s5 }
 0x57e   :  { %v557_v45 = vpop.permute.xlu0 %556 }
 0x57f   :  { %v559_v10 = vadd.f32 %v557_v45, %v553_v44  ;;  %v195_v45 = vadd.f32 %v1809_v22, %v1819_v31 }
 0x581   :  { %1491 = vtanh.f32 %v559_v10 }
 0x587   :  { %v1492_v49 = vpop.eup %1491 }
 0x588   :  { %v561_v35 = vmul.f32 %v1492_v49, %v552_v47 }
 0x58a   :  { %565 = vrot.lane.b32.xlu1 %v561_v35, %s1552_s5 }
 0x5fc   :  { %v566_v50 = vpop.permute.xlu1 %565 }
 0x5fd   :  { %1431 = vmatmul.msk.f32.vlgmr.msra.gmra.mxu0 %vm309_vm2, %v566_v50  ;;  %1432 = vmatmul.msk.f32.vlgmr.msra.gmra.mxu1 %vm309_vm2, %v566_v50 }
 0x67a   :  { %v586_v52 = vpop.f32.mrf.mxu0  ;;  %v606_v53 = vpop.f32.mrf.mxu1 }
 0x67b   :  { %v609_v55 = vadd.f32 %v586_v52, %v148_v51  ;;  %v610_v56 = vadd.f32 %v606_v53, %v189_v54 }
 0x67d   :  { %1493 = vtanh.f32 %v609_v55 }
 0x67e   :  { %1495 = vtanh.f32 %v610_v56 }
 0x683   :  { %v1494_v57 = vpop.eup %1493 }
 0x684   :  { %v613_v58 = vmul.f32 0.5, %v1494_v57  ;;  %v1496_v60 = vpop.eup %1495 }
 0x685   :  { %v614_v32 = vmul.f32 0.5, %v1496_v60 }
 0x686   :  { %v615_v59 = vadd.f32 0.5, %v613_v58  ;;  %v157_v58 = vadd.f32 %v1912_v38, %v1816_v25  ;;  %v841_v25 = vld [vmem:[%s2285_s6 + $0x78] sm:$0xff]  ;;  %v840_v38 = vld [vmem:[%s2285_s6 + $0x70] sm:$0xff] }
 0x687   :  { %v616_v7 = vadd.f32 0.5, %v614_v32  ;;  %846 = vmatpush.msra.mxu0 %v841_v25 }
 0x688   :  { %v618_v61 = vmul.f32 %v1496_v60, %v615_v59  ;;  %v617_v62 = vmul.f32 %v615_v59, %v559_v10 }
 0x689   :  { %847 = vmatpush.msra.mxu0 %v840_v38 }
 0x68a   :  { %620 = vrot.lane.b32.xlu2 %v618_v61, %s1552_s5  ;;  %v198_v61 = vadd.f32 %v1811_v23, %v1819_v31  ;;  %v839_v23 = vld [vmem:[%s2285_s6 + $0x68] sm:$0xff]  ;;  %v838_v31 = vld [vmem:[%s2285_s6 + $0x60] sm:$0xff] }
 0x68b   :  { %848 = vmatpush.msra.mxu0 %v839_v23 }
 0x68d   :  { %849 = vmatpush.msra.mxu0 %v838_v31 }
 0x6e4   :  { %v621_v63 = vpop.permute.xlu2 %620 }
 0x6e5   :  { %v623_v0 = vadd.f32 %v621_v63, %v617_v62 }
 0x6e7   :  { %1497 = vtanh.f32 %v623_v0 }
 0x6ed   :  { %v1498_v8 = vpop.eup %1497 }
 0x6ee   :  { %v625_v20 = vmul.f32 %v1498_v8, %v616_v7 }
 0x6f0   :  { %629 = vrot.lane.b32.xlu0 %v625_v20, %s1552_s5 }
 0x762   :  { %v630_v37 = vpop.permute.xlu0 %629 }
 0x763   :  { %1433 = vmatmul.msk.f32.vlgmr.msra.gmra.mxu2 %vm309_vm2, %v630_v37  ;;  %1434 = vmatmul.msk.f32.vlgmr.msra.gmra.mxu3 %vm309_vm2, %v630_v37  ;;  %v837_v37 = vld [vmem:[%s2285_s6 + $0x58] sm:$0xff] }
 0x764   :  { %850 = vmatpush.msra.mxu0 %v837_v37 }
 0x7e6   :  { %v650_v2 = vpop.f32.mrf.mxu2  ;;  %v670_v5 = vpop.f32.mrf.mxu3 }
 0x7e7   :  { %v673_v12 = vadd.f32 %v650_v2, %v151_v24  ;;  %v674_v14 = vadd.f32 %v670_v5, %v192_v9  ;;  %v836_v24 = vld [vmem:[%s2285_s6 + $0x50] sm:$0xff]  ;;  %v835_v2 = vld [vmem:[%s2285_s6 + $0x48] sm:$0xff]  ;;  %v834_v5 = vld [vmem:[%s2285_s6 + $0x40] sm:$0xff] }
 0x7e8   :  { %851 = vmatpush.msra.mxu0 %v836_v24  ;;  %v833_v9 = vld [vmem:[%s2285_s6 + $0x38] sm:$0xff] }
 0x7e9   :  { %1499 = vtanh.f32 %v673_v12  ;;  %v832_v12 = vld [vmem:[%s2285_s6 + $0x30] sm:$0xff] }
 0x7ea   :  { %1501 = vtanh.f32 %v674_v14  ;;  %852 = vmatpush.msra.mxu0 %v835_v2  ;;  %v831_v14 = vld [vmem:[%s2285_s6 + $0x28] sm:$0xff] }
 0x7ec   :  { %853 = vmatpush.msra.mxu0 %v834_v5 }
 0x7ee   :  { %854 = vmatpush.msra.mxu0 %v833_v9 }
 0x7ef   :  { %v1500_v16 = vpop.eup %1499 }
 0x7f0   :  { %v677_v18 = vmul.f32 0.5, %v1500_v16  ;;  %v1502_v27 = vpop.eup %1501  ;;  %855 = vmatpush.msra.mxu0 %v832_v12 }
 0x7f1   :  { %v678_v34 = vmul.f32 0.5, %v1502_v27 }
 0x7f2   :  { %v679_v21 = vadd.f32 0.5, %v677_v18  ;;  %856 = vmatpush.msra.mxu0 %v831_v14 }
 0x7f3   :  { %v680_v33 = vadd.f32 0.5, %v678_v34 }
 0x7f4   :  { %v682_v28 = vmul.f32 %v1502_v27, %v679_v21  ;;  %v681_v29 = vmul.f32 %v679_v21, %v623_v0  ;;  %v830_v21 = vld [vmem:[%s2285_s6 + $0x20] sm:$0xff] }
 0x7f5   :  { %857 = vmatpush.msra.mxu0 %v830_v21 }
 0x7f6   :  { %684 = vrot.lane.b32.xlu1 %v682_v28, %s1552_s5  ;;  %v829_v28 = vld [vmem:[%s2285_s6 + $0x18] sm:$0xff] }
 0x7f7   :  { %858 = vmatpush.msra.mxu0 %v829_v28 }
 0x868   :  { %v685_v30 = vpop.permute.xlu1 %684 }
 0x869   :  { %v687_v3 = vadd.f32 %v685_v30, %v681_v29  ;;  %v828_v30 = vld [vmem:[%s2285_s6 + $0x10] sm:$0xff] }
 0x86a   :  { %859 = vmatpush.msra.mxu0 %v828_v30 }
 0x86b   :  { %1503 = vtanh.f32 %v687_v3 }
 0x871   :  { %v1504_v40 = vpop.eup %1503 }
 0x872   :  { %v689_v41 = vmul.f32 %v1504_v40, %v680_v33 }
 0x874   :  { %693 = vrot.lane.b32.xlu2 %v689_v41, %s1552_s5  ;;  %v826_v41 = vld [vmem:[%s2285_s6] sm:$0xff] }
 0x8ce   :  { %v694_v39 = vpop.permute.xlu2 %693 }
 0x8cf   :  { %1435 = vmatmul.msk.f32.vlgmr.msrb.gmra.mxu0 %vm309_vm2, %v694_v39  ;;  %1436 = vmatmul.msk.f32.vlgmr.msrb.gmra.mxu1 %vm309_vm2, %v694_v39 }
 0x94c   :  { %v714_v43 = vpop.f32.mrf.mxu0  ;;  %v734_v44 = vpop.f32.mrf.mxu1 }
 0x94d   :  { %v737_v10 = vadd.f32 %v714_v43, %v154_v42  ;;  %v738_v46 = vadd.f32 %v734_v44, %v195_v45  ;;  %v69_v43 = vld [vmem:[%s2287_s9 + $0x18] sm:$0xff]  ;;  %v68_v44 = vld [vmem:[%s2287_s9 + $0x10] sm:$0xff]  ;;  %v67_v45 = vld [vmem:[%s2287_s9 + $0x8] sm:$0xff] }
 0x94e   :  { %890 = vmatpush.msra.mxu1 %v69_v43  ;;  %944 = vmatpush.msra.mxu2 %v69_v43 }
 0x94f   :  { %1505 = vtanh.f32 %v737_v10  ;;  %1106 = vmatpush.msra.mxu3 %v69_v43  ;;  %v66_v10 = vld [vmem:[%s2287_s9] sm:$0xff] }
 0x950   :  { %1507 = vtanh.f32 %v738_v46  ;;  %891 = vmatpush.msra.mxu1 %v68_v44  ;;  %945 = vmatpush.msra.mxu2 %v68_v44  ;;  %v1466_v46 = vld [vmem:[%s2286_s7] ss:$0 sm:$0xff]  ;;  %s1553_s7 = smov 32  }
 0x951   :  { %1107 = vmatpush.msra.mxu3 %v68_v44 }
 0x952   :  { %892 = vmatpush.msra.mxu1 %v67_v45  ;;  %946 = vmatpush.msra.mxu2 %v67_v45 }
 0x953   :  { %1108 = vmatpush.msra.mxu3 %v67_v45 }
 0x954   :  { %893 = vmatpush.msra.mxu1 %v66_v10  ;;  %947 = vmatpush.msra.mxu2 %v66_v10 }
 0x955   :  { %v1506_v47 = vpop.eup %1505  ;;  %1109 = vmatpush.msra.mxu3 %v66_v10 }
 0x956   :  { %v741_v49 = vmul.f32 0.5, %v1506_v47  ;;  %v1508_v50 = vpop.eup %1507  ;;  %998 = vmatpush.msrb.mxu1 %v69_v43 }
 0x957   :  { %v742_v36 = vmul.f32 0.5, %v1508_v50 }
 0x958   :  { %v743_v35 = vadd.f32 0.5, %v741_v49  ;;  %999 = vmatpush.msrb.mxu1 %v68_v44 }
 0x959   :  { %v744_v55 = vadd.f32 0.5, %v742_v36 }
 0x95a   :  { %v746_v51 = vmul.f32 %v1508_v50, %v743_v35  ;;  %v745_v52 = vmul.f32 %v743_v35, %v687_v3  ;;  %v827_v3 = vld [vmem:[%s2285_s6 + $0x8] sm:$0xff]  ;;  %1000 = vmatpush.msrb.mxu1 %v67_v45  ;;  %v276_v50 = vadd.f32 %v1998_v1, %v1987_v26 }
 0x95b   :  { %860 = vmatpush.msra.mxu0 %v827_v3 }
 0x95c   :  { %748 = vrot.lane.b32.xlu0 %v746_v51, %s1552_s5  ;;  %1001 = vmatpush.msrb.mxu1 %v66_v10 }
 0x95d   :  { %861 = vmatpush.msra.mxu0 %v826_v41 }
 0x9ce   :  { %v749_v53 = vpop.permute.xlu0 %748 }
 0x9cf   :  { %v751_v54 = vadd.f32 %v749_v53, %v745_v52 }
 0x9d1   :  { %1509 = vtanh.f32 %v751_v54 }
 0x9d7   :  { %v1510_v56 = vpop.eup %1509 }
 0x9d8   :  { %v753_v57 = vmul.f32 %v1510_v56, %v744_v55 }
 0x9da   :  { %757 = vrot.lane.b32.xlu1 %v753_v57, %s1552_s5 }
 0xa4c   :  { %v758_v22 = vpop.permute.xlu1 %757 }
 0xa4d   :  { %1437 = vmatmul.msk.f32.vlgmr.msrb.gmra.mxu2 %vm309_vm2, %v758_v22  ;;  %1438 = vmatmul.msk.f32.vlgmr.msrb.gmra.mxu3 %vm309_vm2, %v758_v22 }
 0xa4e   :  { %1052 = vmatpush.msrb.mxu2 %v69_v43  ;;  %1268 = vmatpush.msrb.mxu3 %v69_v43 }
 0xa50   :  { %1053 = vmatpush.msrb.mxu2 %v68_v44  ;;  %1269 = vmatpush.msrb.mxu3 %v68_v44 }
 0xa52   :  { %1054 = vmatpush.msrb.mxu2 %v67_v45  ;;  %1270 = vmatpush.msrb.mxu3 %v67_v45 }
 0xa54   :  { %1055 = vmatpush.msrb.mxu2 %v66_v10  ;;  %1271 = vmatpush.msrb.mxu3 %v66_v10 }
 0xad0   :  { %v778_v59 = vpop.f32.mrf.mxu2  ;;  %v798_v60 = vpop.f32.mrf.mxu3 }
 0xad1   :  { %v801_v62 = vadd.f32 %v778_v59, %v157_v58  ;;  %v802_v63 = vadd.f32 %v798_v60, %v198_v61 }
 0xad3   :  { %1511 = vtanh.f32 %v801_v62 }
 0xad4   :  { %1513 = vtanh.f32 %v802_v63 }
 0xad9   :  { %v1512_v0 = vpop.eup %1511 }
 0xada   :  { %v805_v32 = vmul.f32 0.5, %v1512_v0  ;;  %v1514_v8 = vpop.eup %1513 }
 0xadb   :  { %v806_v29 = vmul.f32 0.5, %v1514_v8 }
 0xadc   :  { %v807_v7 = vadd.f32 0.5, %v805_v32 }
 0xadd   :  { %v808_v34 = vadd.f32 0.5, %v806_v29 }
 0xade   :  { %v810_v20 = vmul.f32 %v1514_v8, %v807_v7  ;;  %v809_v16 = vmul.f32 %v807_v7, %v751_v54 }
 0xae0   :  { %812 = vrot.lane.b32.xlu2 %v810_v20, %s1552_s5 }
 0xb3a   :  { %v813_v18 = vpop.permute.xlu2 %812 }
 0xb3b   :  { %v815_v27 = vadd.f32 %v813_v18, %v809_v16 }
 0xb3d   :  { %1515 = vtanh.f32 %v815_v27 }
 0xb43   :  { %v1516_v33 = vpop.eup %1515 }
 0xb44   :  { %v817_v40 = vmul.f32 %v1516_v33, %v808_v34 }
 0xb46   :  { %819 = vrot.lane.b32.xlu0 %v817_v40, %s1552_s5 }
 0xbb8   :  { %v2108_v39 = vpop.permute.xlu0 %819 }
 0xbb9   :  { %v825_v42 = vsel %vm309_vm2, %v2108_v39, %v815_v27 }
 0xbba   :  { %862 = vmatmul.f32.vlgmr.msra.gmra.mxu0 %v825_v42 }
 0xc37   :  { %v863_v47 = vpop.f32.mrf.mxu0 }
 0xc38   :  { %v864_v49 = vadd.f32 %v1466_v46, %v863_v47 }
 0xc3a   :  { %1517 = vtanh.f32 %v864_v49 }
 0xc40   :  { %v1518_v35 = vpop.eup %1517 }
 0xc41   :  { %1439 = vmatmul.msk.f32.vlgmr.msra.gmra.mxu1 %vm823_vm5, %v1518_v35 }
 0xc42   :  { %1160 = vmatpush.msra.mxu1 %v69_v43 }
 0xc44   :  { %1161 = vmatpush.msra.mxu1 %v68_v44 }
 0xc46   :  { %1162 = vmatpush.msra.mxu1 %v67_v45 }
 0xc48   :  { %1163 = vmatpush.msra.mxu1 %v66_v10 }
 0xcbe   :  { %v895_v51 = vpop.f32.mrf.mxu1 }
 0xcbf   :  { %v898_v52 = vadd.f32 %v895_v51, %v276_v50 }
 0xcc1   :  { %1519 = vtanh.f32 %v898_v52 }
 0xcc7   :  { %v1520_v53 = vpop.eup %1519 }
 0xcc8   :  { %904 = vrot.lane.b32.xlu1 %v1520_v53, %s1552_s5  ;;  %v900_v54 = vmul.f32 0.5, %v1520_v53 }
 0xcca   :  { %v901_v36 = vadd.f32 0.5, %v900_v54 }
 0xccc   :  { %v902_v57 = vmul.f32 %v1518_v35, %v901_v36 }
 0xd3a   :  { %v905_v55 = vpop.permute.xlu1 %904 }
 0xd3b   :  { %v907_v56 = vmul.f32 %v905_v55, %v901_v36 }
 0xd3d   :  { %909 = vrot.lane.b32.xlu2 %v907_v56, %s1553_s7 }
 0xd97   :  { %v910_v22 = vpop.permute.xlu2 %909 }
 0xd98   :  { %v912_v58 = vadd.f32 %v910_v22, %v902_v57 }
 0xd9a   :  { %1521 = vtanh.f32 %v912_v58 }
 0xda0   :  { %v1522_v59 = vpop.eup %1521 }
 0xda1   :  { %915 = vrot.lane.b32.xlu0 %v1522_v59, %s1552_s5 }
 0xe13   :  { %v916_v26 = vpop.permute.xlu0 %915 }
 0xe14   :  { %v2133_v1 = vmul.f32 %v916_v26, %v901_v36 }
 0xe16   :  { %928 = vrot.lane.b32.xlu1 %v2133_v1, %s1553_s7 }
 0xe88   :  { %v929_v60 = vpop.permute.xlu1 %928 }
 0xe89   :  { %1440 = vmatmul.msk.f32.vlgmr.msra.gmra.mxu2 %vm823_vm5, %v929_v60 }
 0xe8a   :  { %1214 = vmatpush.msra.mxu2 %v69_v43 }
 0xe8c   :  { %1215 = vmatpush.msra.mxu2 %v68_v44 }
 0xe8e   :  { %1216 = vmatpush.msra.mxu2 %v67_v45 }
 0xe90   :  { %1217 = vmatpush.msra.mxu2 %v66_v10 }
 0xf0c   :  { %v949_v61 = vpop.f32.mrf.mxu2 }
 0xf0d   :  { %v952_v62 = vadd.f32 %v949_v61, %v2001_v4 }
 0xf0f   :  { %1523 = vtanh.f32 %v952_v62 }
 0xf15   :  { %v1524_v63 = vpop.eup %1523 }
 0xf16   :  { %958 = vrot.lane.b32.xlu2 %v1524_v63, %s1552_s5  ;;  %v954_v0 = vmul.f32 0.5, %v1524_v63 }
 0xf18   :  { %v955_v32 = vadd.f32 0.5, %v954_v0 }
 0xf1a   :  { %v956_v20 = vmul.f32 %v955_v32, %v912_v58 }
 0xf70   :  { %v959_v7 = vpop.permute.xlu2 %958 }
 0xf71   :  { %v961_v8 = vmul.f32 %v959_v7, %v955_v32 }
 0xf73   :  { %963 = vrot.lane.b32.xlu0 %v961_v8, %s1553_s7 }
 0xfe5   :  { %v964_v25 = vpop.permute.xlu0 %963 }
 0xfe6   :  { %v966_v38 = vadd.f32 %v964_v25, %v956_v20 }
 0xfe8   :  { %1525 = vtanh.f32 %v966_v38 }
 0xfee   :  { %v1526_v23 = vpop.eup %1525 }
 0xfef   :  { %969 = vrot.lane.b32.xlu1 %v1526_v23, %s1552_s5 }
0x1061   :  { %v970_v31 = vpop.permute.xlu1 %969 }
0x1062   :  { %v2142_v37 = vmul.f32 %v970_v31, %v955_v32 }
0x1064   :  { %982 = vrot.lane.b32.xlu2 %v2142_v37, %s1553_s7 }
0x10be   :  { %v983_v4 = vpop.permute.xlu2 %982 }
0x10bf   :  { %1441 = vmatmul.msk.f32.vlgmr.msrb.gmra.mxu1 %vm823_vm5, %v983_v4 }
0x113c   :  { %v1003_v24 = vpop.f32.mrf.mxu1 }
0x113d   :  { %v1006_v2 = vadd.f32 %v1003_v24, %v2004_v6 }
0x113f   :  { %1527 = vtanh.f32 %v1006_v2 }
0x1145   :  { %v1528_v5 = vpop.eup %1527 }
0x1146   :  { %1012 = vrot.lane.b32.xlu0 %v1528_v5, %s1552_s5  ;;  %v1008_v9 = vmul.f32 0.5, %v1528_v5 }
0x1148   :  { %v1009_v12 = vadd.f32 0.5, %v1008_v9 }
0x114a   :  { %v1010_v18 = vmul.f32 %v1009_v12, %v966_v38 }
0x11b8   :  { %v1013_v14 = vpop.permute.xlu0 %1012 }
0x11b9   :  { %v1015_v16 = vmul.f32 %v1013_v14, %v1009_v12 }
0x11bb   :  { %1017 = vrot.lane.b32.xlu1 %v1015_v16, %s1553_s7 }
0x122d   :  { %v1018_v21 = vpop.permute.xlu1 %1017 }
0x122e   :  { %v1020_v27 = vadd.f32 %v1018_v21, %v1010_v18 }
0x1230   :  { %1529 = vtanh.f32 %v1020_v27 }
0x1236   :  { %v1530_v28 = vpop.eup %1529 }
0x1237   :  { %1023 = vrot.lane.b32.xlu2 %v1530_v28, %s1552_s5 }
0x1291   :  { %v1024_v29 = vpop.permute.xlu2 %1023 }
0x1292   :  { %v2151_v30 = vmul.f32 %v1024_v29, %v1009_v12 }
0x1294   :  { %1036 = vrot.lane.b32.xlu0 %v2151_v30, %s1553_s7 }
0x1306   :  { %v1037_v6 = vpop.permute.xlu0 %1036 }
0x1307   :  { %1442 = vmatmul.msk.f32.vlgmr.msrb.gmra.mxu2 %vm823_vm5, %v1037_v6 }
0x138a   :  { %v1057_v3 = vpop.f32.mrf.mxu2 }
0x138b   :  { %v1060_v34 = vadd.f32 %v1057_v3, %v2007_v11 }
0x138d   :  { %1531 = vtanh.f32 %v1060_v34 }
0x1393   :  { %v1532_v33 = vpop.eup %1531 }
0x1394   :  { %1066 = vrot.lane.b32.xlu1 %v1532_v33, %s1552_s5  ;;  %v1062_v40 = vmul.f32 0.5, %v1532_v33 }
0x1396   :  { %v1063_v41 = vadd.f32 0.5, %v1062_v40 }
0x1398   :  { %v1064_v44 = vmul.f32 %v1063_v41, %v1020_v27  ;;  %v1554_v27 = vmov 1  }
0x1399   :  { %1462 = vset.pattern.permute.xlu1 %v1554_v27  ;;  %1463 = vset.pattern.permute.xlu2 %v1554_v27 }
0x139a   :  { %1464 = vset.pattern.permute.xlu0 %v1554_v27 }
0x1406   :  { %v1067_v42 = vpop.permute.xlu1 %1066 }
0x1407   :  { %v1069_v43 = vmul.f32 %v1067_v42, %v1063_v41 }
0x1409   :  { %1071 = vrot.lane.b32.xlu2 %v1069_v43, %s1553_s7  ;;  %v1555_v43 = vmov 0  }
0x1463   :  { %v1072_v45 = vpop.permute.xlu2 %1071 }
0x1464   :  { %v1074_v10 = vadd.f32 %v1072_v45, %v1064_v44 }
0x1466   :  { %1533 = vtanh.f32 %v1074_v10 }
0x146c   :  { %v1534_v46 = vpop.eup %1533 }
0x146d   :  { %1077 = vrot.lane.b32.xlu0 %v1534_v46, %s1552_s5 }
0x14df   :  { %v1078_v47 = vpop.permute.xlu0 %1077 }
0x14e0   :  { %v2160_v49 = vmul.f32 %v1078_v47, %v1063_v41 }
0x14e2   :  { %1090 = vrot.lane.b32.xlu1 %v2160_v49, %s1553_s7 }
0x1554   :  { %v1091_v11 = vpop.permute.xlu1 %1090 }
0x1555   :  { %1443 = vmatmul.msk.f32.vlgmr.msra.gmra.mxu3 %vm823_vm5, %v1091_v11 }
0x15d8   :  { %v1111_v35 = vpop.f32.mrf.mxu3 }
0x15d9   :  { %v1114_v50 = vadd.f32 %v1111_v35, %v2010_v13 }
0x15db   :  { %1535 = vtanh.f32 %v1114_v50 }
0x15e1   :  { %v1536_v51 = vpop.eup %1535 }
0x15e2   :  { %1120 = vrot.lane.b32.xlu2 %v1536_v51, %s1552_s5  ;;  %v1116_v52 = vmul.f32 0.5, %v1536_v51 }
0x15e4   :  { %v1117_v53 = vadd.f32 0.5, %v1116_v52 }
0x15e6   :  { %v1118_v55 = vmul.f32 %v1117_v53, %v1074_v10 }
0x163c   :  { %v1121_v54 = vpop.permute.xlu2 %1120 }
0x163d   :  { %v1123_v36 = vmul.f32 %v1121_v54, %v1117_v53 }
0x163f   :  { %1125 = vrot.lane.b32.xlu0 %v1123_v36, %s1553_s7 }
0x16b1   :  { %v1126_v56 = vpop.permute.xlu0 %1125 }
0x16b2   :  { %v1128_v57 = vadd.f32 %v1126_v56, %v1118_v55 }
0x16b4   :  { %1537 = vtanh.f32 %v1128_v57 }
0x16ba   :  { %v1538_v22 = vpop.eup %1537 }
0x16bb   :  { %1131 = vrot.lane.b32.xlu1 %v1538_v22, %s1552_s5 }
0x172d   :  { %v1132_v58 = vpop.permute.xlu1 %1131 }
0x172e   :  { %v2169_v59 = vmul.f32 %v1132_v58, %v1117_v53 }
0x1730   :  { %1144 = vrot.lane.b32.xlu2 %v2169_v59, %s1553_s7 }
0x178a   :  { %v1145_v13 = vpop.permute.xlu2 %1144 }
0x178b   :  { %1444 = vmatmul.msk.f32.vlgmr.msra.gmra.mxu1 %vm823_vm5, %v1145_v13 }
0x1808   :  { %v1165_v26 = vpop.f32.mrf.mxu1 }
0x1809   :  { %v1168_v60 = vadd.f32 %v1165_v26, %v2013_v15  ;;  %v1327_v26 = vld [vmem:[%s2289_s11 + $0x60] sm:$0xf] }
0x180a   :  { %1447 = vmatpush.msk.msrb.mxu1 %vm1336_vm1, %v1327_v26 }
0x180b   :  { %1539 = vtanh.f32 %v1168_v60  ;;  %v1326_v60 = vld [vmem:[%s2289_s11 + $0x58] sm:$0xff] }
0x180c   :  { %1344 = vmatpush.msrb.mxu1 %v1326_v60 }
0x1811   :  { %v1540_v61 = vpop.eup %1539 }
0x1812   :  { %1174 = vrot.lane.b32.xlu0 %v1540_v61, %s1552_s5  ;;  %v1170_v62 = vmul.f32 0.5, %v1540_v61 }
0x1814   :  { %v1171_v63 = vadd.f32 0.5, %v1170_v62  ;;  %v1325_v62 = vld [vmem:[%s2289_s11 + $0x50] sm:$0xff] }
0x1815   :  { %1345 = vmatpush.msrb.mxu1 %v1325_v62 }
0x1816   :  { %v1172_v7 = vmul.f32 %v1171_v63, %v1128_v57 }
0x1884   :  { %v1175_v0 = vpop.permute.xlu0 %1174 }
0x1885   :  { %v1177_v32 = vmul.f32 %v1175_v0, %v1171_v63 }
0x1887   :  { %1179 = vrot.lane.b32.xlu1 %v1177_v32, %s1553_s7  ;;  %v1323_v32 = vld [vmem:[%s2289_s11 + $0x40] sm:$0xff] }
0x18f9   :  { %v1180_v8 = vpop.permute.xlu1 %1179 }
0x18fa   :  { %v1182_v20 = vadd.f32 %v1180_v8, %v1172_v7  ;;  %v1322_v7 = vld [vmem:[%s2289_s11 + $0x38] sm:$0xff] }
0x18fc   :  { %1541 = vtanh.f32 %v1182_v20 }
0x1902   :  { %v1542_v25 = vpop.eup %1541 }
0x1903   :  { %1185 = vrot.lane.b32.xlu2 %v1542_v25, %s1552_s5 }
0x195d   :  { %v1186_v38 = vpop.permute.xlu2 %1185 }
0x195e   :  { %v2178_v23 = vmul.f32 %v1186_v38, %v1171_v63  ;;  %v1324_v63 = vld [vmem:[%s2289_s11 + $0x48] sm:$0xff] }
0x195f   :  { %1346 = vmatpush.msrb.mxu1 %v1324_v63  ;;  %v1320_v38 = vld [vmem:[%s2289_s11 + $0x28] sm:$0xff] }
0x1960   :  { %1198 = vrot.lane.b32.xlu0 %v2178_v23, %s1553_s7 }
0x1961   :  { %1347 = vmatpush.msrb.mxu1 %v1323_v32 }
0x1963   :  { %1348 = vmatpush.msrb.mxu1 %v1322_v7 }
0x19d2   :  { %v1199_v15 = vpop.permute.xlu0 %1198 }
0x19d3   :  { %1445 = vmatmul.msk.f32.vlgmr.msra.gmra.mxu2 %vm823_vm5, %v1199_v15 }
0x1a56   :  { %v1219_v31 = vpop.f32.mrf.mxu2 }
0x1a57   :  { %v1222_v4 = vadd.f32 %v1219_v31, %v2016_v17  ;;  %v867_v17 = vld [vmem:[%s2288_s2] sm:$0xff]  ;;  %s1556_s2 = smov 96  }
0x1a58   :  { %v868_v28 = vmul.f32 8.0, %v867_v17  ;;  %v1319_v31 = vld [vmem:[%s2289_s11 + $0x20] sm:$0xff] }
0x1a59   :  { %1543 = vtanh.f32 %v1222_v4 }
0x1a5a   :  { %v1452_v29 = vceil.f32 %v868_v28  ;;  %v1453_v6 = vfloor.f32 %v868_v28  ;;  %vm1451_vm6 = vcmp.lt.s32.totalorder %v868_v28, 0 }
0x1a5c   :  { %v1454_v3 = vsel %vm1451_vm6, %v1452_v29, %v1453_v6  ;;  %v824_v6 = vsel %vm823_vm5, %v2108_v39, %v1829_v48  ;;  %v1467_v48 = vld [vmem:[%s2290_s12] ss:$0 sm:$0xff] }
0x1a5d   :  { %v1455_v34 = vcvt.f32.s32 %v1454_v3 }
0x1a5f   :  { %v1544_v24 = vpop.eup %1543  ;;  %vm870_vm7 = vcmp.gt.s32.totalorder %v1455_v34, 0 }
0x1a60   :  { %1228 = vrot.lane.b32.xlu1 %v1544_v24, %s1552_s5  ;;  %v1224_v2 = vmul.f32 0.5, %v1544_v24  ;;  %v871_v33 = vsel %vm870_vm7, %v1455_v34, 0  ;;  %v1318_v24 = vld [vmem:[%s2289_s11 + $0x18] sm:$0xff] }
0x1a61   :  { %vm872_vm8 = vcmp.lt.s32.totalorder %v871_v33, 7 }
0x1a62   :  { %v1225_v5 = vadd.f32 0.5, %v1224_v2  ;;  %v873_v42 = vsel %vm872_vm8, %v871_v33, 7 }
0x1a63   :  { %vm919_vm9 = vcmp.eq.s32.totalorder %v873_v42, 0  ;;  %vm973_vm10 = vcmp.eq.s32.totalorder %v873_v42, 1  ;;  %vm1081_vm11 = vcmp.eq.s32.totalorder %v873_v42, 3  ;;  %vm1189_vm12 = vcmp.eq.s32.totalorder %v873_v42, 5 }
0x1a64   :  { %v1226_v14 = vmul.f32 %v1225_v5, %v1182_v20  ;;  %v920_v44 = vsel %vm919_vm9, 1, %v1555_v43  ;;  %v974_v11 = vsel %vm973_vm10, 1, %v1555_v43  ;;  %v1082_v35 = vsel %vm1081_vm11, 1, %v1555_v43  ;;  %v1321_v20 = vld [vmem:[%s2289_s11 + $0x30] sm:$0xff] }
0x1a65   :  { %vm1135_vm13 = vcmp.eq.s32.totalorder %v873_v42, 4  ;;  %v1190_v50 = vsel %vm1189_vm12, 1, %v1555_v43  ;;  %vm1243_vm14 = vcmp.eq.s32.totalorder %v873_v42, 6  ;;  %vm1297_vm15 = vcmp.eq.s32.totalorder %v873_v42, 7  ;;  %1349 = vmatpush.msrb.mxu1 %v1321_v20 }
0x1a66   :  { %v1136_v51 = vsel %vm1135_vm13, 1, %v1555_v43  ;;  %v1244_v52 = vsel %vm1243_vm14, 1, %v1555_v43  ;;  %vm1027_vm0 = vcmp.eq.s32.totalorder %v873_v42, 2  ;;  %vm1313_vm12 = vcmask 785408  }
0x1a67   :  { %v1028_v56 = vsel %vm1027_vm0, 1, %v1555_v43  ;;  %1350 = vmatpush.msrb.mxu1 %v1320_v38  ;;  %vm1332_vm13 = vcmask 818176  }
0x1a69   :  { %1351 = vmatpush.msrb.mxu1 %v1319_v31 }
0x1a6b   :  { %1352 = vmatpush.msrb.mxu1 %v1318_v24 }
0x1ad2   :  { %v1229_v9 = vpop.permute.xlu1 %1228 }
0x1ad3   :  { %v1231_v12 = vmul.f32 %v1229_v9, %v1225_v5  ;;  %v1317_v9 = vld [vmem:[%s2289_s11 + $0x10] sm:$0xff] }
0x1ad4   :  { %1353 = vmatpush.msrb.mxu1 %v1317_v9 }
0x1ad5   :  { %1233 = vrot.lane.b32.xlu2 %v1231_v12, %s1553_s7 }
0x1b2f   :  { %v1234_v16 = vpop.permute.xlu2 %1233 }
0x1b30   :  { %v1236_v18 = vadd.f32 %v1234_v16, %v1226_v14 }
0x1b32   :  { %1545 = vtanh.f32 %v1236_v18 }
0x1b38   :  { %v1546_v21 = vpop.eup %1545 }
0x1b39   :  { %1239 = vrot.lane.b32.xlu0 %v1546_v21, %s1552_s5 }
0x1bab   :  { %v1240_v40 = vpop.permute.xlu0 %1239 }
0x1bac   :  { %v2190_v41 = vmul.f32 %v1240_v40, %v1225_v5  ;;  %v1362_v40 = vld [vmem:[%s2291_s13 + $0x8] sm:$0xff] }
0x1bae   :  { %1252 = vrot.lane.b32.xlu1 %v2190_v41, %s1553_s7 }
0x1bb6   :  { %922 = vperm.xlu1 %1462, %v920_v44   ;;  %v1468_v44 = vld [vmem:[%s2292_s14] ss:$0 sm:$0xff] }
0x1bbe   :  { %1084 = vperm.xlu1 %1462, %v1082_v35  }
0x1bc6   :  { %1192 = vperm.xlu1 %1462, %v1190_v50  }
0x1c20   :  { %v1253_v45 = vpop.permute.xlu1 %1252 }
0x1c21   :  { %1446 = vmatmul.msk.f32.vlgmr.msrb.gmra.mxu3 %vm823_vm5, %v1253_v45 }
0x1c28   :  { %v923_v61 = vpop.permute.xlu1 %922 }
0x1c29   :  { %vm924_vm3 = vcmp.eq.s32.totalorder %v923_v61, 1 }
0x1c2a   :  { %v925_v4 = vsel %vm924_vm3, %v2133_v1, 0.0  ;;  %v1316_v1 = vld [vmem:[%s2289_s11 + $0x8] sm:$0xff] }
0x1c2b   :  { %1354 = vmatpush.msrb.mxu1 %v1316_v1 }
0x1c30   :  { %v1085_v8 = vpop.permute.xlu1 %1084 }
0x1c31   :  { %vm1086_vm7 = vcmp.eq.s32.totalorder %v1085_v8, 1 }
0x1c38   :  { %v1193_v12 = vpop.permute.xlu1 %1192 }
0x1c39   :  { %vm1194_vm9 = vcmp.eq.s32.totalorder %v1193_v12, 1 }
0x1ca4   :  { %v1273_v10 = vpop.f32.mrf.mxu3 }
0x1ca5   :  { %v1276_v46 = vadd.f32 %v1273_v10, %v2019_v19  ;;  %v1298_v19 = vsel %vm1297_vm15, 1, %v1555_v43 }
0x1ca6   :  { %1300 = vperm.xlu1 %1462, %v1298_v19  }
0x1ca7   :  { %1547 = vtanh.f32 %v1276_v46 }
0x1cad   :  { %v1548_v47 = vpop.eup %1547 }
0x1cae   :  { %1282 = vrot.lane.b32.xlu2 %v1548_v47, %s1552_s5  ;;  %v1278_v53 = vmul.f32 0.5, %v1548_v47 }
0x1cb0   :  { %v2197_v54 = vadd.f32 0.5, %v1278_v53 }
0x1cb2   :  { %v1280_v57 = vmul.f32 %v2197_v54, %v1236_v18 }
0x1cb6   :  { %976 = vperm.xlu2 %1463, %v974_v11  }
0x1cbe   :  { %1138 = vperm.xlu2 %1463, %v1136_v51  }
0x1cc6   :  { %1246 = vperm.xlu2 %1463, %v1244_v52  }
0x1d08   :  { %v1283_v36 = vpop.permute.xlu2 %1282 }
0x1d09   :  { %v1285_v55 = vmul.f32 %v1283_v36, %v2197_v54 }
0x1d0b   :  { %1287 = vrot.lane.b32.xlu0 %v1285_v55, %s1553_s7 }
0x1d10   :  { %v977_v0 = vpop.permute.xlu2 %976 }
0x1d11   :  { %vm978_vm4 = vcmp.eq.s32.totalorder %v977_v0, 1 }
0x1d12   :  { %v979_v2 = vsel %vm978_vm4, %v2142_v37, %v925_v4 }
0x1d13   :  { %1030 = vperm.xlu0 %1464, %v1028_v56  }
0x1d18   :  { %v1139_v15 = vpop.permute.xlu2 %1138  ;;  %v1301_v18 = vpop.permute.xlu1 %1300 }
0x1d19   :  { %vm1140_vm8 = vcmp.eq.s32.totalorder %v1139_v15, 1  ;;  %vm1302_vm11 = vcmp.eq.s32.totalorder %v1301_v18, 1 }
0x1d20   :  { %v1247_v16 = vpop.permute.xlu2 %1246 }
0x1d21   :  { %vm1248_vm10 = vcmp.eq.s32.totalorder %v1247_v16, 1 }
0x1d7d   :  { %v1288_v22 = vpop.permute.xlu0 %1287 }
0x1d7e   :  { %v1290_v58 = vadd.f32 %v1288_v22, %v1280_v57 }
0x1d80   :  { %1549 = vtanh.f32 %v1290_v58 }
0x1d85   :  { %v1031_v25 = vpop.permute.xlu0 %1030 }
0x1d86   :  { %v1550_v13 = vpop.eup %1549  ;;  %vm1032_vm6 = vcmp.eq.s32.totalorder %v1031_v25, 1 }
0x1d87   :  { %1293 = vrot.lane.b32.xlu0 %v1550_v13, %s1552_s5  ;;  %v1033_v5 = vsel %vm1032_vm6, %v2151_v30, %v979_v2 }
0x1d88   :  { %v1087_v14 = vsel %vm1086_vm7, %v2160_v49, %v1033_v5  ;;  %v1315_v49 = vld [vmem:[%s2289_s11] sm:$0xff] }
0x1d89   :  { %v1141_v37 = vsel %vm1140_vm8, %v2169_v59, %v1087_v14  ;;  %1355 = vmatpush.msrb.mxu1 %v1315_v49  ;;  %v1364_v59 = vld [vmem:[%s2291_s13 + $0x18] sm:$0xff] }
0x1d8a   :  { %v1195_v30 = vsel %vm1194_vm9, %v2178_v23, %v1141_v37  ;;  %v1363_v23 = vld [vmem:[%s2291_s13 + $0x10] sm:$0xff]  ;;  %1384 = vmatpush.msrb.mxu2 %v1364_v59 }
0x1d8c   :  { %1385 = vmatpush.msrb.mxu2 %v1363_v23 }
0x1d8e   :  { %1386 = vmatpush.msrb.mxu2 %v1362_v40 }
0x1d8f   :  { %1309 = vrot.lane.b32.xlu0 %v867_v17, %s1556_s2  ;;  %v1249_v17 = vsel %vm1248_vm10, %v2190_v41, %v1195_v30  ;;  %v1361_v41 = vld [vmem:[%s2291_s13] sm:$0xff] }
0x1d90   :  { %1387 = vmatpush.msrb.mxu2 %v1361_v41 }
0x1df9   :  { %v1294_v21 = vpop.permute.xlu0 %1293 }
0x1dfa   :  { %v1296_v27 = vmul.f32 %v1294_v21, %v2197_v54 }
0x1dfc   :  { %v1303_v28 = vsel %vm1302_vm11, %v1296_v27, %v1249_v17 }
0x1dfd   :  { %1305 = vrot.lane.b32.xlu2 %v1303_v28, %s1556_s2 }
0x1e01   :  { %v1310_v29 = vpop.permute.xlu0 %1309 }
0x1e57   :  { %v1306_v3 = vpop.permute.xlu2 %1305 }
0x1e58   :  { %v1312_v34 = vsel %vm309_vm2, %v824_v6, %v1306_v3  ;;  %vm1392_vm2 = vcmask 97280  }
0x1e59   :  { %v1314_v33 = vsel %vm1313_vm12, %v1312_v34, %v1310_v29 }
0x1e5a   :  { %1448 = vmatmul.msk.f32.vlgmr.msrb.gmra.mxu1 %vm1332_vm13, %v1314_v33 }
0x1ed7   :  { %v1357_v39 = vpop.f32.mrf.mxu1 }
0x1ed8   :  { %v1358_v42 = vadd.f32 %v1467_v48, %v1357_v39 }
0x1eda   :  { %v1360_v43 = vmax.f32 %v1358_v42, 0.0 }
0x1edc   :  { %1449 = vmatmul.msk.f32.vlgmr.msrb.gmra.mxu2 %vm823_vm5, %v1360_v43 }
0x1f5f   :  { %v1389_v45 = vpop.f32.mrf.mxu2 }
0x1f60   :  { %v1390_v10 = vadd.f32 %v1468_v44, %v1389_v45 }
0x1f62   :  { %1393 = vst.msk [vmem:[%s2293_s15] sm:$0xff] %vm1392_vm2, %v1390_v10 }

</bundles_post_ra>
